<compile_context>
chip_gen: v7x
topology: tpu7x:2x2x1
jax: 0.10.0
libtpu: 0.0.40
codegen_flags: <defaults>
</compile_context>

<pallas_src>
from functools import partial

import jax
import jax.numpy as jnp
from jax.experimental import pallas as pl
from jax.experimental.pallas import tpu as pltpu

NEG_SLOPE = 0.1
EPS = 1e-5


def _cdiv(a, b):
    return (a + b - 1) // b


# ------------------------------- fused kernel --------------------------------

def _make_block_kernel(*, stride, Ho, Wo, Cin, Cp, equal_in_out):
    s = stride
    p_res = (1 % s) * s + (1 % s)   # phase of padded coordinate 1 (1x1 shortcut)
    r0 = 1 // s                     # in-phase offset of padded coordinate 1

    def kernel(a1_ref, w1_ref, s2_ref, b2_ref, w2_ref, extra_ref, o_ref,
               act2_ref):
        # ---- conv1 (3x3, stride s, pad 1) on the pre-activated bf16 input ----
        # Cin is tiny & lane-unaligned here, so keep per-tap MXU dots; at
        # production widths Cin is lane-padded and folded like conv2 below.
        acc1 = jnp.zeros((Ho * Wo, Cp), jnp.float32)
        for kh in range(3):
            for kw in range(3):
                p = (kh % s) * s + (kw % s)
                oh, ow = kh // s, kw // s
                a = a1_ref[0, p, oh:oh + Ho, ow:ow + Wo, :].reshape(Ho * Wo, Cin)
                acc1 = acc1 + jnp.dot(a, w1_ref[kh * 3 + kw],
                                      preferred_element_type=jnp.float32)

        # ---- BN2 + LeakyReLU epilogue (f32 VPU) ------------------------------
        y = acc1 * s2_ref[...] + b2_ref[...]
        y = jnp.where(y >= 0.0, y, NEG_SLOPE * y)

        # Stash the activated conv1 output with a zero 1-px halo in VMEM (f32:
        # keeps the fused inter-stage tensor full precision, per review).
        zrow = jnp.zeros((1, Wo + 2, Cp), jnp.float32)
        zcol = jnp.zeros((Ho, 1, Cp), jnp.float32)
        act2_ref[0:1, :, :] = zrow
        act2_ref[Ho + 1:Ho + 2, :, :] = zrow
        act2_ref[1:1 + Ho, 0:1, :] = zcol
        act2_ref[1:1 + Ho, Wo + 1:Wo + 2, :] = zcol
        act2_ref[1:1 + Ho, 1:1 + Wo, :] = y.reshape(Ho, Wo, Cp)

        # ---- conv2 (3x3, stride 1, pad 1): ONE K = 9*Cp matmul ---------------
        taps = []
        for kh in range(3):
            for kw in range(3):
                t = act2_ref[kh:kh + Ho, kw:kw + Wo, :].reshape(Ho * Wo, Cp)
                taps.append(t.astype(jnp.bfloat16))
        a2 = jnp.concatenate(taps, axis=-1)              # (Ho*Wo, 9*Cp) bf16
        acc = jnp.dot(a2, w2_ref[...], preferred_element_type=jnp.float32)

        # ---- residual / 1x1 shortcut, fused ----------------------------------
        if equal_in_out:
            acc = acc + extra_ref[0].reshape(Ho * Wo, Cp)   # exact f32 add
        else:
            r = a1_ref[0, p_res, r0:r0 + Ho, r0:r0 + Wo, :].reshape(Ho * Wo, Cin)
            acc = acc + jnp.dot(r, extra_ref[...],
                                preferred_element_type=jnp.float32)

        o_ref[...] = acc.reshape(1, Ho, Wo, Cp).astype(o_ref.dtype)

    return kernel


def fused_basic_block(a1ph, w1, scale2p, shift2p, w2, extra, *, stride, Ho, Wo,
                      equal_in_out):
    N, SS, Hps, Wps, Cin = a1ph.shape
    Cp = w2.shape[-1]
    kernel = _make_block_kernel(stride=stride, Ho=Ho, Wo=Wo, Cin=Cin, Cp=Cp,
                                equal_in_out=equal_in_out)
    if equal_in_out:
        extra_spec = pl.BlockSpec((1, Ho, Wo, Cp), lambda n: (n, 0, 0, 0))
    else:
        extra_spec = pl.BlockSpec((Cin, Cp), lambda n: (0, 0))

    return pl.pallas_call(
        kernel,
        out_shape=jax.ShapeDtypeStruct((N, Ho, Wo, Cp), jnp.float32),
        grid=(N,),
        in_specs=[
            pl.BlockSpec((1, SS, Hps, Wps, Cin), lambda n: (n, 0, 0, 0, 0)),
            pl.BlockSpec((9, Cin, Cp), lambda n: (0, 0, 0)),
            pl.BlockSpec((1, Cp), lambda n: (0, 0)),
            pl.BlockSpec((1, Cp), lambda n: (0, 0)),
            pl.BlockSpec((9 * Cp, Cp), lambda n: (0, 0)),
            extra_spec,
        ],
        out_specs=pl.BlockSpec((1, Ho, Wo, Cp), lambda n: (n, 0, 0, 0)),
        scratch_shapes=[pltpu.VMEM((Ho + 2, Wo + 2, Cp), jnp.float32)],
        compiler_params=pltpu.CompilerParams(
            dimension_semantics=("parallel",)),
    )(a1ph, w1, scale2p, shift2p, w2, extra)


# -------------------------------- JAX glue -----------------------------------

def _fold_bn(gamma, beta, mean, var):
    scale = gamma / jnp.sqrt(var + EPS)
    shift = beta - mean * scale
    return scale.astype(jnp.float32), shift.astype(jnp.float32)


def _conv3x3_to_mat(w_oihw, cin_pad_to, cout_pad_to, fold):
    """(Cout, Cin, 3, 3) torch-style -> (9, ci, co) or folded (9*ci, co) bf16."""
    co, ci, kh, kw = w_oihw.shape
    w = jnp.transpose(w_oihw, (2, 3, 1, 0)).reshape(kh * kw, ci, co)
    w = jnp.pad(w, ((0, 0), (0, cin_pad_to - ci), (0, cout_pad_to - co)))
    if fold:
        w = w.reshape(kh * kw * cin_pad_to, cout_pad_to)
    return w.astype(jnp.bfloat16)


def _pad_and_phase(x_nhwc, stride):
    """Zero-pad by 1 and (for stride > 1) decompose into stride*stride phases:
    out[n, b*s+d, a, c, :] = padded[n, a*s+b, c*s+d, :].  Returns bf16."""
    N, H, W, C = x_nhwc.shape
    s = stride
    if s == 1:          # phase decomposition is the identity -> skip relayout
        xp = jnp.pad(x_nhwc, ((0, 0), (1, 1), (1, 1), (0, 0)))
        return xp[:, None].astype(jnp.bfloat16)
    Hp = s * _cdiv(H + 2, s)
    Wp = s * _cdiv(W + 2, s)
    xp = jnp.pad(x_nhwc, ((0, 0), (1, Hp - H - 1), (1, Wp - W - 1), (0, 0)))
    xph = xp.reshape(N, Hp // s, s, Wp // s, s, C)
    xph = jnp.transpose(xph, (0, 2, 4, 1, 3, 5))
    return xph.reshape(N, s * s, Hp // s, Wp // s, C).astype(jnp.bfloat16)


def init_basic_block_params(key, in_planes, out_planes, stride):
    ks = jax.random.split(key, 11)
    p = {}
    p["bn1_gamma"] = 1.0 + 0.1 * jax.random.normal(ks[0], (in_planes,))
    p["bn1_beta"] = 0.1 * jax.random.normal(ks[1], (in_planes,))
    p["bn1_mean"] = 0.1 * jax.random.normal(ks[2], (in_planes,))
    p["bn1_var"] = 1.0 + 0.1 * jnp.abs(jax.random.normal(ks[3], (in_planes,)))
    p["conv1_w"] = 0.1 * jax.random.normal(ks[4], (out_planes, in_planes, 3, 3))
    p["bn2_gamma"] = 1.0 + 0.1 * jax.random.normal(ks[5], (out_planes,))
    p["bn2_beta"] = 0.1 * jax.random.normal(ks[6], (out_planes,))
    p["bn2_mean"] = 0.1 * jax.random.normal(ks[7], (out_planes,))
    p["bn2_var"] = 1.0 + 0.1 * jnp.abs(jax.random.normal(ks[8], (out_planes,)))
    p["conv2_w"] = 0.1 * jax.random.normal(ks[9], (out_planes, out_planes, 3, 3))
    if in_planes != out_planes:
        p["convsc_w"] = 0.1 * jax.random.normal(
            ks[10], (out_planes, in_planes, 1, 1))
    return jax.tree_util.tree_map(lambda a: a.astype(jnp.float32), p)


@partial(jax.jit, static_argnames=("in_planes", "out_planes", "stride",
                                   "drop_rate", "activate_before_residual"))
def basic_block_forward(params, x_nchw, in_planes, out_planes, stride,
                        drop_rate=0.0, activate_before_residual=False):
    # TODO(synk): training-mode dropout (drop_rate > 0) is not implemented.
    assert drop_rate == 0.0
    equal_in_out = in_planes == out_planes
    if equal_in_out:
        assert stride == 1, "identity residual requires stride 1"
    N, Ci, H, W = x_nchw.shape
    assert Ci == in_planes
    x = jnp.transpose(x_nchw, (0, 2, 3, 1)).astype(jnp.float32)   # NHWC

    Cp = 128 * _cdiv(out_planes, 128)          # lane-dense output channels
    Ho = (H - 1) // stride + 1
    Wo = (W - 1) // stride + 1

    scale1, shift1 = _fold_bn(params["bn1_gamma"], params["bn1_beta"],
                              params["bn1_mean"], params["bn1_var"])
    scale2, shift2 = _fold_bn(params["bn2_gamma"], params["bn2_beta"],
                              params["bn2_mean"], params["bn2_var"])
    scale2p = jnp.concatenate(
        [scale2, jnp.ones((Cp - out_planes,), jnp.float32)]).reshape(1, Cp)
    shift2p = jnp.concatenate(
        [shift2, jnp.zeros((Cp - out_planes,), jnp.float32)]).reshape(1, Cp)

    # conv1 (and, when in != out, the 1x1 shortcut) consume BN1+LReLU(x) iff
    # apply_act1; otherwise raw x (matches the module's branching exactly).
    apply_act1 = equal_in_out or activate_before_residual
    if apply_act1:
        a1 = x * scale1.reshape(1, 1, 1, -1) + shift1.reshape(1, 1, 1, -1)
        a1 = jnp.where(a1 >= 0.0, a1, NEG_SLOPE * a1)
    else:
        a1 = x
    # One fused XLA pass: BN1+LReLU + zero-pad + phase relayout + bf16 cast.
    a1ph = _pad_and_phase(a1, stride)

    w1 = _conv3x3_to_mat(params["conv1_w"], in_planes, Cp, fold=False)
    w2 = _conv3x3_to_mat(params["conv2_w"], Cp, Cp, fold=True)

    if equal_in_out:
        # Raw-x residual, lane-padded to Cp, added exactly in f32 in-kernel.
        extra = jnp.pad(x, ((0, 0), (0, 0), (0, 0), (0, Cp - out_planes)))
    else:
        extra = jnp.pad(params["convsc_w"][:, :, 0, 0].T,
                        ((0, 0), (0, Cp - out_planes))).astype(jnp.bfloat16)

    out = fused_basic_block(a1ph, w1, scale2p, shift2p, w2, extra,
                            stride=stride, Ho=Ho, Wo=Wo,
                            equal_in_out=equal_in_out)
    out = out[..., :out_planes]
    return jnp.transpose(out, (0, 3, 1, 2))    # back to NCHW


# ---------------------------- pure-JAX reference -----------------------------

def reference_forward(params, x_nchw, in_planes, out_planes, stride,
                      activate_before_residual=False):
    equal_in_out = in_planes == out_planes

    def bn_act(t, g, b, m, v):
        scale = (g / jnp.sqrt(v + EPS))[None, :, None, None]
        shift = (b - m * g / jnp.sqrt(v + EPS))[None, :, None, None]
        y = t * scale + shift
        return jnp.where(y >= 0, y, NEG_SLOPE * y)

    def conv(t, w, s, p):
        return jax.lax.conv_general_dilated(
            t, w, (s, s), ((p, p), (p, p)),
            dimension_numbers=("NCHW", "OIHW", "NCHW"))

    x = x_nchw.astype(jnp.float32)
    if (not equal_in_out) and activate_before_residual:
        x = bn_act(x, params["bn1_gamma"], params["bn1_beta"],
                   params["bn1_mean"], params["bn1_var"])
        c1_in = x
    else:
        out = bn_act(x, params["bn1_gamma"], params["bn1_beta"],
                     params["bn1_mean"], params["bn1_var"])
        c1_in = out if equal_in_out else x
    out = conv(c1_in, params["conv1_w"], stride, 1)
    out = bn_act(out, params["bn2_gamma"], params["bn2_beta"],
                 params["bn2_mean"], params["bn2_var"])
    out = conv(out, params["conv2_w"], 1, 1)
    res = x if equal_in_out else conv(x, params["convsc_w"], stride, 0)
    return res + out


# ----------------------------------- main ------------------------------------

if __name__ == "__main__":
    key = jax.random.PRNGKey(0)
    cases = [
        dict(in_planes=4, out_planes=8, stride=2, abr=True),    # shortcut, act-before-res
        dict(in_planes=8, out_planes=8, stride=1, abr=False),   # identity residual (f32 add)
        dict(in_planes=4, out_planes=8, stride=1, abr=False),   # shortcut on raw x
    ]
    for i, c in enumerate(cases):
        kx, kp = jax.random.split(jax.random.fold_in(key, i))
        x = jax.random.normal(kx, (2, c["in_planes"], 16, 16), dtype=jnp.float32)
        params = init_basic_block_params(kp, c["in_planes"], c["out_planes"],
                                         c["stride"])
        out = basic_block_forward(params, x,
                                  in_planes=c["in_planes"],
                                  out_planes=c["out_planes"],
                                  stride=c["stride"],
                                  drop_rate=0.0,
                                  activate_before_residual=c["abr"])
        out = jax.block_until_ready(out)

        ref = reference_forward(params, x, c["in_planes"], c["out_planes"],
                                c["stride"],
                                activate_before_residual=c["abr"])
        Ho = (16 - 1) // c["stride"] + 1
        assert out.shape == (2, c["out_planes"], Ho, Ho), out.shape
        err = float(jnp.max(jnp.abs(out - ref)))
        # bf16 MXU inputs with f32 accumulation -> loosened tolerance
        assert jnp.allclose(out, ref, atol=5e-2, rtol=5e-2), (i, err)
    print("KERNEL_OK")
</pallas_src>

<mosaic_0001>
module attributes {stable_mosaic.version = 11 : i64} {
  func.func @kernel(%arg0: i32, %arg1: memref<1x4x9x9x4xbf16, #tpu.memory_space<vmem>>, %arg2: memref<9x4x128xbf16, #tpu.memory_space<vmem>>, %arg3: memref<1x128xf32, #tpu.memory_space<vmem>>, %arg4: memref<1x128xf32, #tpu.memory_space<vmem>>, %arg5: memref<1152x128xbf16, #tpu.memory_space<vmem>>, %arg6: memref<4x128xbf16, #tpu.memory_space<vmem>>, %arg7: memref<1x8x8x128xf32, #tpu.memory_space<vmem>>, %arg8: memref<10x10x128xf32, #tpu.memory_space<vmem>>) attributes {dimension_semantics = [#tpu.dimension_semantics<parallel>], iteration_bounds = array<i64: 2>, scalar_prefetch = 0 : i64, scratch_operands = 1 : i64, tpu.core_type = #tpu.core_type<tc>, window_params = [{transform_indices = @transform_0, window_bounds = array<i64: 1, 4, 9, 9, 4>}, {pipeline_mode = #tpu.pipeline_mode<synchronous>, transform_indices = @transform_1, window_bounds = array<i64: 9, 4, 128>}, {pipeline_mode = #tpu.pipeline_mode<synchronous>, transform_indices = @transform_2, window_bounds = array<i64: 1, 128>}, {pipeline_mode = #tpu.pipeline_mode<synchronous>, transform_indices = @transform_3, window_bounds = array<i64: 1, 128>}, {pipeline_mode = #tpu.pipeline_mode<synchronous>, transform_indices = @transform_4, window_bounds = array<i64: 1152, 128>}, {pipeline_mode = #tpu.pipeline_mode<synchronous>, transform_indices = @transform_5, window_bounds = array<i64: 4, 128>}, {transform_indices = @transform_6, window_bounds = array<i64: 1, 8, 8, 128>}]} {
    %cst = arith.constant 0.000000e+00 : f32
    %0 = vector.broadcast %cst : f32 to vector<64x128xf32>
    %c0 = arith.constant 0 : index
    %c0_0 = arith.constant 0 : index
    %c0_1 = arith.constant 0 : index
    %c0_2 = arith.constant 0 : index
    %c0_3 = arith.constant 0 : index
    %1 = vector.load %arg1[%c0, %c0_0, %c0_1, %c0_2, %c0_3] : memref<1x4x9x9x4xbf16, #tpu.memory_space<vmem>>, vector<1x1x8x8x4xbf16>
    %2 = vector.shape_cast %1 : vector<1x1x8x8x4xbf16> to vector<8x8x4xbf16>
    %3 = vector.shape_cast %2 : vector<8x8x4xbf16> to vector<64x4xbf16>
    %c0_4 = arith.constant 0 : index
    %c0_5 = arith.constant 0 : index
    %c0_6 = arith.constant 0 : index
    %4 = vector.load %arg2[%c0_4, %c0_5, %c0_6] : memref<9x4x128xbf16, #tpu.memory_space<vmem>>, vector<1x4x128xbf16>
    %5 = vector.shape_cast %4 : vector<1x4x128xbf16> to vector<4x128xbf16>
    %cst_7 = arith.constant dense<0.000000e+00> : vector<64x128xf32>
    %6 = tpu.matmul %3, %5, %cst_7 {dimension_numbers = #tpu.dot_dimension_numbers<[1], [0], [0], [1], [0, 0, 1, 1], [], []>} : vector<64x4xbf16>, vector<4x128xbf16>, vector<64x128xf32> -> vector<64x128xf32>
    %7 = arith.addf %0, %6 : vector<64x128xf32>
    %c0_8 = arith.constant 0 : index
    %c1 = arith.constant 1 : index
    %c0_9 = arith.constant 0 : index
    %c0_10 = arith.constant 0 : index
    %c0_11 = arith.constant 0 : index
    %8 = vector.load %arg1[%c0_8, %c1, %c0_9, %c0_10, %c0_11] : memref<1x4x9x9x4xbf16, #tpu.memory_space<vmem>>, vector<1x1x8x8x4xbf16>
    %9 = vector.shape_cast %8 : vector<1x1x8x8x4xbf16> to vector<8x8x4xbf16>
    %10 = vector.shape_cast %9 : vector<8x8x4xbf16> to vector<64x4xbf16>
    %c1_12 = arith.constant 1 : index
    %c0_13 = arith.constant 0 : index
    %c0_14 = arith.constant 0 : index
    %11 = vector.load %arg2[%c1_12, %c0_13, %c0_14] : memref<9x4x128xbf16, #tpu.memory_space<vmem>>, vector<1x4x128xbf16>
    %12 = vector.shape_cast %11 : vector<1x4x128xbf16> to vector<4x128xbf16>
    %cst_15 = arith.constant dense<0.000000e+00> : vector<64x128xf32>
    %13 = tpu.matmul %10, %12, %cst_15 {dimension_numbers = #tpu.dot_dimension_numbers<[1], [0], [0], [1], [0, 0, 1, 1], [], []>} : vector<64x4xbf16>, vector<4x128xbf16>, vector<64x128xf32> -> vector<64x128xf32>
    %14 = arith.addf %7, %13 : vector<64x128xf32>
    %c0_16 = arith.constant 0 : index
    %c0_17 = arith.constant 0 : index
    %c0_18 = arith.constant 0 : index
    %c1_19 = arith.constant 1 : index
    %c0_20 = arith.constant 0 : index
    %15 = vector.load %arg1[%c0_16, %c0_17, %c0_18, %c1_19, %c0_20] : memref<1x4x9x9x4xbf16, #tpu.memory_space<vmem>>, vector<1x1x8x8x4xbf16>
    %16 = vector.shape_cast %15 : vector<1x1x8x8x4xbf16> to vector<8x8x4xbf16>
    %17 = vector.shape_cast %16 : vector<8x8x4xbf16> to vector<64x4xbf16>
    %c2 = arith.constant 2 : index
    %c0_21 = arith.constant 0 : index
    %c0_22 = arith.constant 0 : index
    %18 = vector.load %arg2[%c2, %c0_21, %c0_22] : memref<9x4x128xbf16, #tpu.memory_space<vmem>>, vector<1x4x128xbf16>
    %19 = vector.shape_cast %18 : vector<1x4x128xbf16> to vector<4x128xbf16>
    %cst_23 = arith.constant dense<0.000000e+00> : vector<64x128xf32>
    %20 = tpu.matmul %17, %19, %cst_23 {dimension_numbers = #tpu.dot_dimension_numbers<[1], [0], [0], [1], [0, 0, 1, 1], [], []>} : vector<64x4xbf16>, vector<4x128xbf16>, vector<64x128xf32> -> vector<64x128xf32>
    %21 = arith.addf %14, %20 : vector<64x128xf32>
    %c0_24 = arith.constant 0 : index
    %c2_25 = arith.constant 2 : index
    %c0_26 = arith.constant 0 : index
    %c0_27 = arith.constant 0 : index
    %c0_28 = arith.constant 0 : index
    %22 = vector.load %arg1[%c0_24, %c2_25, %c0_26, %c0_27, %c0_28] : memref<1x4x9x9x4xbf16, #tpu.memory_space<vmem>>, vector<1x1x8x8x4xbf16>
    %23 = vector.shape_cast %22 : vector<1x1x8x8x4xbf16> to vector<8x8x4xbf16>
    %24 = vector.shape_cast %23 : vector<8x8x4xbf16> to vector<64x4xbf16>
    %c3 = arith.constant 3 : index
    %c0_29 = arith.constant 0 : index
    %c0_30 = arith.constant 0 : index
    %25 = vector.load %arg2[%c3, %c0_29, %c0_30] : memref<9x4x128xbf16, #tpu.memory_space<vmem>>, vector<1x4x128xbf16>
    %26 = vector.shape_cast %25 : vector<1x4x128xbf16> to vector<4x128xbf16>
    %cst_31 = arith.constant dense<0.000000e+00> : vector<64x128xf32>
    %27 = tpu.matmul %24, %26, %cst_31 {dimension_numbers = #tpu.dot_dimension_numbers<[1], [0], [0], [1], [0, 0, 1, 1], [], []>} : vector<64x4xbf16>, vector<4x128xbf16>, vector<64x128xf32> -> vector<64x128xf32>
    %28 = arith.addf %21, %27 : vector<64x128xf32>
    %c0_32 = arith.constant 0 : index
    %c3_33 = arith.constant 3 : index
    %c0_34 = arith.constant 0 : index
    %c0_35 = arith.constant 0 : index
    %c0_36 = arith.constant 0 : index
    %29 = vector.load %arg1[%c0_32, %c3_33, %c0_34, %c0_35, %c0_36] : memref<1x4x9x9x4xbf16, #tpu.memory_space<vmem>>, vector<1x1x8x8x4xbf16>
    %30 = vector.shape_cast %29 : vector<1x1x8x8x4xbf16> to vector<8x8x4xbf16>
    %31 = vector.shape_cast %30 : vector<8x8x4xbf16> to vector<64x4xbf16>
    %c4 = arith.constant 4 : index
    %c0_37 = arith.constant 0 : index
    %c0_38 = arith.constant 0 : index
    %32 = vector.load %arg2[%c4, %c0_37, %c0_38] : memref<9x4x128xbf16, #tpu.memory_space<vmem>>, vector<1x4x128xbf16>
    %33 = vector.shape_cast %32 : vector<1x4x128xbf16> to vector<4x128xbf16>
    %cst_39 = arith.constant dense<0.000000e+00> : vector<64x128xf32>
    %34 = tpu.matmul %31, %33, %cst_39 {dimension_numbers = #tpu.dot_dimension_numbers<[1], [0], [0], [1], [0, 0, 1, 1], [], []>} : vector<64x4xbf16>, vector<4x128xbf16>, vector<64x128xf32> -> vector<64x128xf32>
    %35 = arith.addf %28, %34 : vector<64x128xf32>
    %c0_40 = arith.constant 0 : index
    %c2_41 = arith.constant 2 : index
    %c0_42 = arith.constant 0 : index
    %c1_43 = arith.constant 1 : index
    %c0_44 = arith.constant 0 : index
    %36 = vector.load %arg1[%c0_40, %c2_41, %c0_42, %c1_43, %c0_44] : memref<1x4x9x9x4xbf16, #tpu.memory_space<vmem>>, vector<1x1x8x8x4xbf16>
    %37 = vector.shape_cast %36 : vector<1x1x8x8x4xbf16> to vector<8x8x4xbf16>
    %38 = vector.shape_cast %37 : vector<8x8x4xbf16> to vector<64x4xbf16>
    %c5 = arith.constant 5 : index
    %c0_45 = arith.constant 0 : index
    %c0_46 = arith.constant 0 : index
    %39 = vector.load %arg2[%c5, %c0_45, %c0_46] : memref<9x4x128xbf16, #tpu.memory_space<vmem>>, vector<1x4x128xbf16>
    %40 = vector.shape_cast %39 : vector<1x4x128xbf16> to vector<4x128xbf16>
    %cst_47 = arith.constant dense<0.000000e+00> : vector<64x128xf32>
    %41 = tpu.matmul %38, %40, %cst_47 {dimension_numbers = #tpu.dot_dimension_numbers<[1], [0], [0], [1], [0, 0, 1, 1], [], []>} : vector<64x4xbf16>, vector<4x128xbf16>, vector<64x128xf32> -> vector<64x128xf32>
    %42 = arith.addf %35, %41 : vector<64x128xf32>
    %c0_48 = arith.constant 0 : index
    %c0_49 = arith.constant 0 : index
    %c1_50 = arith.constant 1 : index
    %c0_51 = arith.constant 0 : index
    %c0_52 = arith.constant 0 : index
    %43 = vector.load %arg1[%c0_48, %c0_49, %c1_50, %c0_51, %c0_52] : memref<1x4x9x9x4xbf16, #tpu.memory_space<vmem>>, vector<1x1x8x8x4xbf16>
    %44 = vector.shape_cast %43 : vector<1x1x8x8x4xbf16> to vector<8x8x4xbf16>
    %45 = vector.shape_cast %44 : vector<8x8x4xbf16> to vector<64x4xbf16>
    %c6 = arith.constant 6 : index
    %c0_53 = arith.constant 0 : index
    %c0_54 = arith.constant 0 : index
    %46 = vector.load %arg2[%c6, %c0_53, %c0_54] : memref<9x4x128xbf16, #tpu.memory_space<vmem>>, vector<1x4x128xbf16>
    %47 = vector.shape_cast %46 : vector<1x4x128xbf16> to vector<4x128xbf16>
    %cst_55 = arith.constant dense<0.000000e+00> : vector<64x128xf32>
    %48 = tpu.matmul %45, %47, %cst_55 {dimension_numbers = #tpu.dot_dimension_numbers<[1], [0], [0], [1], [0, 0, 1, 1], [], []>} : vector<64x4xbf16>, vector<4x128xbf16>, vector<64x128xf32> -> vector<64x128xf32>
    %49 = arith.addf %42, %48 : vector<64x128xf32>
    %c0_56 = arith.constant 0 : index
    %c1_57 = arith.constant 1 : index
    %c1_58 = arith.constant 1 : index
    %c0_59 = arith.constant 0 : index
    %c0_60 = arith.constant 0 : index
    %50 = vector.load %arg1[%c0_56, %c1_57, %c1_58, %c0_59, %c0_60] : memref<1x4x9x9x4xbf16, #tpu.memory_space<vmem>>, vector<1x1x8x8x4xbf16>
    %51 = vector.shape_cast %50 : vector<1x1x8x8x4xbf16> to vector<8x8x4xbf16>
    %52 = vector.shape_cast %51 : vector<8x8x4xbf16> to vector<64x4xbf16>
    %c7 = arith.constant 7 : index
    %c0_61 = arith.constant 0 : index
    %c0_62 = arith.constant 0 : index
    %53 = vector.load %arg2[%c7, %c0_61, %c0_62] : memref<9x4x128xbf16, #tpu.memory_space<vmem>>, vector<1x4x128xbf16>
    %54 = vector.shape_cast %53 : vector<1x4x128xbf16> to vector<4x128xbf16>
    %cst_63 = arith.constant dense<0.000000e+00> : vector<64x128xf32>
    %55 = tpu.matmul %52, %54, %cst_63 {dimension_numbers = #tpu.dot_dimension_numbers<[1], [0], [0], [1], [0, 0, 1, 1], [], []>} : vector<64x4xbf16>, vector<4x128xbf16>, vector<64x128xf32> -> vector<64x128xf32>
    %56 = arith.addf %49, %55 : vector<64x128xf32>
    %c0_64 = arith.constant 0 : index
    %c0_65 = arith.constant 0 : index
    %c1_66 = arith.constant 1 : index
    %c1_67 = arith.constant 1 : index
    %c0_68 = arith.constant 0 : index
    %57 = vector.load %arg1[%c0_64, %c0_65, %c1_66, %c1_67, %c0_68] : memref<1x4x9x9x4xbf16, #tpu.memory_space<vmem>>, vector<1x1x8x8x4xbf16>
    %58 = vector.shape_cast %57 : vector<1x1x8x8x4xbf16> to vector<8x8x4xbf16>
    %59 = vector.shape_cast %58 : vector<8x8x4xbf16> to vector<64x4xbf16>
    %c8 = arith.constant 8 : index
    %c0_69 = arith.constant 0 : index
    %c0_70 = arith.constant 0 : index
    %60 = vector.load %arg2[%c8, %c0_69, %c0_70] : memref<9x4x128xbf16, #tpu.memory_space<vmem>>, vector<1x4x128xbf16>
    %61 = vector.shape_cast %60 : vector<1x4x128xbf16> to vector<4x128xbf16>
    %cst_71 = arith.constant dense<0.000000e+00> : vector<64x128xf32>
    %62 = tpu.matmul %59, %61, %cst_71 {dimension_numbers = #tpu.dot_dimension_numbers<[1], [0], [0], [1], [0, 0, 1, 1], [], []>} : vector<64x4xbf16>, vector<4x128xbf16>, vector<64x128xf32> -> vector<64x128xf32>
    %63 = arith.addf %56, %62 : vector<64x128xf32>
    %c0_72 = arith.constant 0 : index
    %c0_73 = arith.constant 0 : index
    %64 = vector.load %arg3[%c0_72, %c0_73] : memref<1x128xf32, #tpu.memory_space<vmem>>, vector<1x128xf32>
    %65 = vector.broadcast %64 : vector<1x128xf32> to vector<64x128xf32>
    %66 = arith.mulf %63, %65 : vector<64x128xf32>
    %c0_74 = arith.constant 0 : index
    %c0_75 = arith.constant 0 : index
    %67 = vector.load %arg4[%c0_74, %c0_75] : memref<1x128xf32, #tpu.memory_space<vmem>>, vector<1x128xf32>
    %68 = vector.broadcast %67 : vector<1x128xf32> to vector<64x128xf32>
    %69 = arith.addf %66, %68 : vector<64x128xf32>
    %cst_76 = arith.constant 0.000000e+00 : f32
    %70 = vector.broadcast %cst_76 : f32 to vector<64x128xf32>
    %71 = arith.cmpf oge, %69, %70 : vector<64x128xf32>
    %cst_77 = arith.constant 1.000000e-01 : f32
    %72 = vector.broadcast %cst_77 : f32 to vector<64x128xf32>
    %73 = arith.mulf %72, %69 : vector<64x128xf32>
    %74 = arith.select %71, %69, %73 : vector<64x128xi1>, vector<64x128xf32>
    %cst_78 = arith.constant 0.000000e+00 : f32
    %75 = vector.broadcast %cst_78 : f32 to vector<1x10x128xf32>
    %cst_79 = arith.constant 0.000000e+00 : f32
    %76 = vector.broadcast %cst_79 : f32 to vector<8x1x128xf32>
    %c0_80 = arith.constant 0 : index
    %c0_81 = arith.constant 0 : index
    %c0_82 = arith.constant 0 : index
    %77 = vector.load %arg8[%c0_80, %c0_81, %c0_82] : memref<10x10x128xf32, #tpu.memory_space<vmem>>, vector<1x10x128xf32>
    tpu.vector_store %arg8[%c0_80, %c0_81, %c0_82], %75 {strides = array<i32>} : memref<10x10x128xf32, #tpu.memory_space<vmem>>, vector<1x10x128xf32>,
    %c9 = arith.constant 9 : index
    %c0_83 = arith.constant 0 : index
    %c0_84 = arith.constant 0 : index
    %78 = vector.load %arg8[%c9, %c0_83, %c0_84] : memref<10x10x128xf32, #tpu.memory_space<vmem>>, vector<1x10x128xf32>
    tpu.vector_store %arg8[%c9, %c0_83, %c0_84], %75 {strides = array<i32>} : memref<10x10x128xf32, #tpu.memory_space<vmem>>, vector<1x10x128xf32>,
    %c1_85 = arith.constant 1 : index
    %c0_86 = arith.constant 0 : index
    %c0_87 = arith.constant 0 : index
    %79 = vector.load %arg8[%c1_85, %c0_86, %c0_87] : memref<10x10x128xf32, #tpu.memory_space<vmem>>, vector<8x1x128xf32>
    tpu.vector_store %arg8[%c1_85, %c0_86, %c0_87], %76 {strides = array<i32>} : memref<10x10x128xf32, #tpu.memory_space<vmem>>, vector<8x1x128xf32>,
    %c1_88 = arith.constant 1 : index
    %c9_89 = arith.constant 9 : index
    %c0_90 = arith.constant 0 : index
    %80 = vector.load %arg8[%c1_88, %c9_89, %c0_90] : memref<10x10x128xf32, #tpu.memory_space<vmem>>, vector<8x1x128xf32>
    tpu.vector_store %arg8[%c1_88, %c9_89, %c0_90], %76 {strides = array<i32>} : memref<10x10x128xf32, #tpu.memory_space<vmem>>, vector<8x1x128xf32>,
    %81 = vector.shape_cast %74 : vector<64x128xf32> to vector<8x8x128xf32>
    %c1_91 = arith.constant 1 : index
    %c1_92 = arith.constant 1 : index
    %c0_93 = arith.constant 0 : index
    %82 = vector.load %arg8[%c1_91, %c1_92, %c0_93] : memref<10x10x128xf32, #tpu.memory_space<vmem>>, vector<8x8x128xf32>
    tpu.vector_store %arg8[%c1_91, %c1_92, %c0_93], %81 {strides = array<i32>} : memref<10x10x128xf32, #tpu.memory_space<vmem>>, vector<8x8x128xf32>,
    %c0_94 = arith.constant 0 : index
    %c0_95 = arith.constant 0 : index
    %c0_96 = arith.constant 0 : index
    %83 = vector.load %arg8[%c0_94, %c0_95, %c0_96] : memref<10x10x128xf32, #tpu.memory_space<vmem>>, vector<8x8x128xf32>
    %84 = vector.shape_cast %83 : vector<8x8x128xf32> to vector<64x128xf32>
    %85 = arith.truncf %84 : vector<64x128xf32> to vector<64x128xbf16>
    %c0_97 = arith.constant 0 : index
    %c1_98 = arith.constant 1 : index
    %c0_99 = arith.constant 0 : index
    %86 = vector.load %arg8[%c0_97, %c1_98, %c0_99] : memref<10x10x128xf32, #tpu.memory_space<vmem>>, vector<8x8x128xf32>
    %87 = vector.shape_cast %86 : vector<8x8x128xf32> to vector<64x128xf32>
    %88 = arith.truncf %87 : vector<64x128xf32> to vector<64x128xbf16>
    %c0_100 = arith.constant 0 : index
    %c2_101 = arith.constant 2 : index
    %c0_102 = arith.constant 0 : index
    %89 = vector.load %arg8[%c0_100, %c2_101, %c0_102] : memref<10x10x128xf32, #tpu.memory_space<vmem>>, vector<8x8x128xf32>
    %90 = vector.shape_cast %89 : vector<8x8x128xf32> to vector<64x128xf32>
    %91 = arith.truncf %90 : vector<64x128xf32> to vector<64x128xbf16>
    %c1_103 = arith.constant 1 : index
    %c0_104 = arith.constant 0 : index
    %c0_105 = arith.constant 0 : index
    %92 = vector.load %arg8[%c1_103, %c0_104, %c0_105] : memref<10x10x128xf32, #tpu.memory_space<vmem>>, vector<8x8x128xf32>
    %93 = vector.shape_cast %92 : vector<8x8x128xf32> to vector<64x128xf32>
    %94 = arith.truncf %93 : vector<64x128xf32> to vector<64x128xbf16>
    %c1_106 = arith.constant 1 : index
    %c1_107 = arith.constant 1 : index
    %c0_108 = arith.constant 0 : index
    %95 = vector.load %arg8[%c1_106, %c1_107, %c0_108] : memref<10x10x128xf32, #tpu.memory_space<vmem>>, vector<8x8x128xf32>
    %96 = vector.shape_cast %95 : vector<8x8x128xf32> to vector<64x128xf32>
    %97 = arith.truncf %96 : vector<64x128xf32> to vector<64x128xbf16>
    %c1_109 = arith.constant 1 : index
    %c2_110 = arith.constant 2 : index
    %c0_111 = arith.constant 0 : index
    %98 = vector.load %arg8[%c1_109, %c2_110, %c0_111] : memref<10x10x128xf32, #tpu.memory_space<vmem>>, vector<8x8x128xf32>
    %99 = vector.shape_cast %98 : vector<8x8x128xf32> to vector<64x128xf32>
    %100 = arith.truncf %99 : vector<64x128xf32> to vector<64x128xbf16>
    %c2_112 = arith.constant 2 : index
    %c0_113 = arith.constant 0 : index
    %c0_114 = arith.constant 0 : index
    %101 = vector.load %arg8[%c2_112, %c0_113, %c0_114] : memref<10x10x128xf32, #tpu.memory_space<vmem>>, vector<8x8x128xf32>
    %102 = vector.shape_cast %101 : vector<8x8x128xf32> to vector<64x128xf32>
    %103 = arith.truncf %102 : vector<64x128xf32> to vector<64x128xbf16>
    %c2_115 = arith.constant 2 : index
    %c1_116 = arith.constant 1 : index
    %c0_117 = arith.constant 0 : index
    %104 = vector.load %arg8[%c2_115, %c1_116, %c0_117] : memref<10x10x128xf32, #tpu.memory_space<vmem>>, vector<8x8x128xf32>
    %105 = vector.shape_cast %104 : vector<8x8x128xf32> to vector<64x128xf32>
    %106 = arith.truncf %105 : vector<64x128xf32> to vector<64x128xbf16>
    %c2_118 = arith.constant 2 : index
    %c2_119 = arith.constant 2 : index
    %c0_120 = arith.constant 0 : index
    %107 = vector.load %arg8[%c2_118, %c2_119, %c0_120] : memref<10x10x128xf32, #tpu.memory_space<vmem>>, vector<8x8x128xf32>
    %108 = vector.shape_cast %107 : vector<8x8x128xf32> to vector<64x128xf32>
    %109 = arith.truncf %108 : vector<64x128xf32> to vector<64x128xbf16>
    %110 = tpu.concatenate %85, %88, %91, %94, %97, %100, %103, %106, %109 in 1 : vector<64x128xbf16>, vector<64x128xbf16>, vector<64x128xbf16>, vector<64x128xbf16>, vector<64x128xbf16>, vector<64x128xbf16>, vector<64x128xbf16>, vector<64x128xbf16>, vector<64x128xbf16> -> vector<64x1152xbf16>
    %c0_121 = arith.constant 0 : index
    %c0_122 = arith.constant 0 : index
    %111 = vector.load %arg5[%c0_121, %c0_122] : memref<1152x128xbf16, #tpu.memory_space<vmem>>, vector<1152x128xbf16>
    %cst_123 = arith.constant dense<0.000000e+00> : vector<64x128xf32>
    %112 = tpu.matmul %110, %111, %cst_123 {dimension_numbers = #tpu.dot_dimension_numbers<[1], [0], [0], [1], [0, 0, 1, 1], [], []>} : vector<64x1152xbf16>, vector<1152x128xbf16>, vector<64x128xf32> -> vector<64x128xf32>
    %c0_124 = arith.constant 0 : index
    %c3_125 = arith.constant 3 : index
    %c0_126 = arith.constant 0 : index
    %c0_127 = arith.constant 0 : index
    %c0_128 = arith.constant 0 : index
    %113 = vector.load %arg1[%c0_124, %c3_125, %c0_126, %c0_127, %c0_128] : memref<1x4x9x9x4xbf16, #tpu.memory_space<vmem>>, vector<1x1x8x8x4xbf16>
    %114 = vector.shape_cast %113 : vector<1x1x8x8x4xbf16> to vector<8x8x4xbf16>
    %115 = vector.shape_cast %114 : vector<8x8x4xbf16> to vector<64x4xbf16>
    %c0_129 = arith.constant 0 : index
    %c0_130 = arith.constant 0 : index
    %116 = vector.load %arg6[%c0_129, %c0_130] : memref<4x128xbf16, #tpu.memory_space<vmem>>, vector<4x128xbf16>
    %cst_131 = arith.constant dense<0.000000e+00> : vector<64x128xf32>
    %117 = tpu.matmul %115, %116, %cst_131 {dimension_numbers = #tpu.dot_dimension_numbers<[1], [0], [0], [1], [0, 0, 1, 1], [], []>} : vector<64x4xbf16>, vector<4x128xbf16>, vector<64x128xf32> -> vector<64x128xf32>
    %118 = arith.addf %112, %117 : vector<64x128xf32>
    %119 = vector.shape_cast %118 : vector<64x128xf32> to vector<1x8x8x128xf32>
    %c0_132 = arith.constant 0 : index
    %c0_133 = arith.constant 0 : index
    %c0_134 = arith.constant 0 : index
    %c0_135 = arith.constant 0 : index
    %120 = vector.load %arg7[%c0_132, %c0_133, %c0_134, %c0_135] : memref<1x8x8x128xf32, #tpu.memory_space<vmem>>, vector<1x8x8x128xf32>
    tpu.vector_store %arg7[%c0_132, %c0_133, %c0_134, %c0_135], %119 {strides = array<i32>} : memref<1x8x8x128xf32, #tpu.memory_space<vmem>>, vector<1x8x8x128xf32>,
    return
  }
  func.func @transform_0(%arg0: i32) -> (i32, i32, i32, i32, i32) {
    %c0_i32 = arith.constant 0 : i32
    %c0_i32_0 = arith.constant 0 : i32
    %c0_i32_1 = arith.constant 0 : i32
    %c0_i32_2 = arith.constant 0 : i32
    %c0_i32_3 = arith.constant 0 : i32
    return %arg0, %c0_i32, %c0_i32_0, %c0_i32_1, %c0_i32_2 : i32, i32, i32, i32, i32
  }
  func.func @transform_1(%arg0: i32) -> (i32, i32, i32) {
    %c0_i32 = arith.constant 0 : i32
    %c0_i32_0 = arith.constant 0 : i32
    %c0_i32_1 = arith.constant 0 : i32
    %c0_i32_2 = arith.constant 0 : i32
    return %c0_i32, %c0_i32_0, %c0_i32_1 : i32, i32, i32
  }
  func.func @transform_2(%arg0: i32) -> (i32, i32) {
    %c0_i32 = arith.constant 0 : i32
    %c0_i32_0 = arith.constant 0 : i32
    %c0_i32_1 = arith.constant 0 : i32
    return %c0_i32, %c0_i32_0 : i32, i32
  }
  func.func @transform_3(%arg0: i32) -> (i32, i32) {
    %c0_i32 = arith.constant 0 : i32
    %c0_i32_0 = arith.constant 0 : i32
    %c0_i32_1 = arith.constant 0 : i32
    return %c0_i32, %c0_i32_0 : i32, i32
  }
  func.func @transform_4(%arg0: i32) -> (i32, i32) {
    %c0_i32 = arith.constant 0 : i32
    %c0_i32_0 = arith.constant 0 : i32
    %c0_i32_1 = arith.constant 0 : i32
    return %c0_i32, %c0_i32_0 : i32, i32
  }
  func.func @transform_5(%arg0: i32) -> (i32, i32) {
    %c0_i32 = arith.constant 0 : i32
    %c0_i32_0 = arith.constant 0 : i32
    %c0_i32_1 = arith.constant 0 : i32
    return %c0_i32, %c0_i32_0 : i32, i32
  }
  func.func @transform_6(%arg0: i32) -> (i32, i32, i32, i32) {
    %c0_i32 = arith.constant 0 : i32
    %c0_i32_0 = arith.constant 0 : i32
    %c0_i32_1 = arith.constant 0 : i32
    %c0_i32_2 = arith.constant 0 : i32
    return %arg0, %c0_i32, %c0_i32_0, %c0_i32_1 : i32, i32, i32, i32
  }
}

</mosaic_0001>

<bundles_post_ra>
// kernel: basic_block_forward.1
= control target key start
LH: loop header
LB: loop body
LE: loop exit
PB: predicated region body
PF: predicated region fallthrough
CT: control target
= control target key end

     0   :  { %s3793_s21 = smov 0   ;;  %s4600_s0 = inlined_call_operand.vmem [shape: bf16[2,4,9,9,4], index: 0, kind: input, shape index: {}]   ;;  %s4601_s1 = inlined_call_operand.vmem [shape: bf16[9,4,128], index: 1, kind: input, shape index: {}]   ;;  %s4602_s2 = inlined_call_operand.vmem [shape: f32[1,128], index: 2, kind: input, shape index: {}]   ;;  %s4603_s3 = inlined_call_operand.vmem [shape: f32[1,128], index: 3, kind: input, shape index: {}]   ;;  %s4604_s4 = inlined_call_operand.vmem [shape: bf16[1152,128], index: 4, kind: input, shape index: {}]   ;;  %s4605_s5 = inlined_call_operand.vmem [shape: bf16[4,128], index: 5, kind: input, shape index: {}]   ;;  %s4606_s6 = inlined_call_operand.vmem [shape: f32[2,8,8,128], index: 6, kind: output, shape index: {}]  }
   0x1 LB: > { %s2910_s22 = sadd.s32 4294967295, %s3755_s21   ;;  %p2914_p0 = scmp.ge.s32.totalorder %s3755_s21, 1  ;;  %s3755_s21 = sphi %s3793_s21, %s16_s21  }
   0x2   : > { %p212_p1 = scmp.lt.s32.totalorder %s3755_s21, 3 }
   0x4   : > { %p213_p2 = pnand %p2914_p0, %p212_p1 }
   0x5   : > { %v2926_v0 = vld [vmem:[%s4601_s1 + $0x2] sm:$0x3] (!%p213_p2)  ;;  %vm306_vm0 = vcmask (!%p213_p2), 1041408   ;;  %p242_p3 = scmp.lt.s32.totalorder (!%p213_p2), %s2910_s22, 1  ;;  %v261_v2 = vld [vmem:[%s4601_s1] sm:$0x3] (!%p213_p2) }
   0x6   : > { %216 = sbr.rel (%p213_p2) target bundleno = 723 (0x2d3), region = 44  ;;  %3629 = vmatprep.subr.msk.bf16.mxu0 (!%p213_p2), %vm306_vm0, %v2926_v0  ;;  %v308_v1 = vsel (!%p213_p2), %vm306_vm0, %v2926_v0, 0  ;;  %vm293_vm1 = vcmask (!%p213_p2), 31744   ;;  %v408_v3 = vsel (!%p213_p2), %vm306_vm0, %v261_v2, 0  ;;  %v2943_v5 = vld [vmem:[%s4601_s1 + $0x4] sm:$0x3] (!%p213_p2) }
   0x7   : > { %3386 = vmatpush3.bf16.msra.mxu0 (!%p213_p2), %v308_v1  ;;  %vm491_vm2 = vsmask.f32 (!%p213_p2), 3328  ;;  %vm492_vm3 = vsmask.f32 (!%p213_p2), 7440  ;;  %v633_v50 = vsel (!%p213_p2), %vm306_vm0, %v2943_v5, 0  ;;  %v4195_v40 = vld [vmem:[%s4604_s4 + $0x210] sm:$0xff] (!%p213_p2)  }
   0x8   : > { %3630 = vmatprep.subr.msk.bf16.mxu0 (!%p213_p2), %vm306_vm0, %v261_v2  ;;  %vm3846_vm4 = vmor (!%p213_p2), %vm491_vm2, %vm492_vm3  ;;  %v2960_v55 = vld [vmem:[%s4601_s1 + $0x6] sm:$0x3] (!%p213_p2) }
   0xd   : > { %s4610_s22 = smov (!%p242_p3, %s2910_s22), 1 }
   0xe   : > { %s3639_s27 = smul.u32 288, %s4610_s22 }
  0x10   : > { %s3816_s30 = scalar_lea.vmem %s4600_s0, %s3639_s27 }
  0x11   : > { %v3649_v4 = vld [vmem:[%s3816_s30 + $0x48] ss:$8 sps:$4 sm:$0xff]   ;;  %v3650_v6 = vld [vmem:[%s3816_s30 + $0x58] ss:$8 sps:$4 sm:$0xff]   ;;  %v476_v11 = vld [vmem:[%s3816_s30 + $0x4] sm:$0x1] }
  0x12   : > { %3387 = vmatprep.mubr.msk.bf16.mxu0 %vm293_vm1, %v3649_v4  ;;  %v3651_v7 = vld [vmem:[%s3816_s30 + $0x68] ss:$8 sps:$4 sm:$0xff]   ;;  %v3652_v8 = vld [vmem:[%s3816_s30 + $0x78] ss:$8 sps:$4 sm:$0xff]   ;;  %v478_v13 = vld [vmem:[%s3816_s30 + $0xc] sm:$0x1] }
  0x13   : > { %3388 = vmatmul.mubr.msk.bf16.vlgmr.msra.gmra.mrb[0].mxu0 %vm293_vm1, %v3650_v6  ;;  %v3653_v9 = vld [vmem:[%s3816_s30] ss:$8 sps:$4 sm:$0xff]   ;;  %v504_v17 = vshll.u32 %v476_v11, 16  ;;  %v479_v19 = vld [vmem:[%s3816_s30 + $0x10] sm:$0xf]  ;;  %v518_v23 = vshll.u32 %v478_v13, 16 }
  0x14   : > { %3396 = vmatpush3.bf16.msra.mxu0 %v408_v3  ;;  %3391 = vmatprep.mubr.msk.bf16.mxu0 %vm293_vm1, %v3651_v7  ;;  %v475_v10 = vld [vmem:[%s3816_s30] sm:$0xf]  ;;  %v477_v12 = vld [vmem:[%s3816_s30 + $0x8] sm:$0xf]  ;;  %v481_v24 = vld [vmem:[%s3816_s30 + $0x18] sm:$0xf] }
  0x15   : > { %3631 = vmatprep.subr.msk.bf16.mxu0 %vm306_vm0, %v2943_v5  ;;  %v495_v14 = vshrl.u32 %v475_v10, 16  ;;  %v498_v15 = vshll.u32 %v475_v10, 16  ;;  %v509_v16 = vshrl.u32 %v477_v12, 16  ;;  %v512_v18 = vshll.u32 %v477_v12, 16  ;;  %v3654_v28 = vld [vmem:[%s3816_s30 + $0x10] ss:$8 sps:$4 sm:$0xff]  }
  0x16   : > { %v523_v26 = vshrl.u32 %v479_v19, 16  ;;  %v526_v27 = vshll.u32 %v479_v19, 16  ;;  %v480_v30 = vld [vmem:[%s3816_s30 + $0x14] sm:$0x1]  ;;  %v537_v31 = vshrl.u32 %v481_v24, 16  ;;  %v540_v32 = vshll.u32 %v481_v24, 16 }
  0x17   : > { %v497_v20 = vrot.slane %v495_v14, 4  ;;  %v500_v21 = vrot.slane %v498_v15, 5  ;;  %v511_v22 = vrot.slane %v509_v16, 4  ;;  %v514_v25 = vrot.slane %v512_v18, 5  ;;  %v483_v33 = vld [vmem:[%s3816_s30 + $0x20] sm:$0xf] }
  0x18   : > { %v3655_v34 = vld [vmem:[%s3816_s30 + $0x20] ss:$8 sps:$4 sm:$0xff]   ;;  %v506_v35 = vrot.slane %v504_v17, 5  ;;  %v482_v37 = vld [vmem:[%s3816_s30 + $0x1c] sm:$0x1]  ;;  %v525_v38 = vrot.slane %v523_v26, 4 }
  0x19   : > { %v501_v29 = vor.u32 %v500_v21, %v497_v20  ;;  %v515_v36 = vor.u32 %v514_v25, %v511_v22  ;;  %v528_v39 = vrot.slane %v526_v27, 5  ;;  %v520_v42 = vrot.slane %v518_v23, 5  ;;  %v485_v45 = vld [vmem:[%s3816_s30 + $0x28] sm:$0xf]  ;;  %v484_v48 = vld [vmem:[%s3816_s30 + $0x24] sm:$0x1] }
  0x1a   : > { %v539_v43 = vrot.slane %v537_v31, 4  ;;  %v542_v44 = vrot.slane %v540_v32, 5  ;;  %v532_v47 = vshll.u32 %v480_v30, 16  ;;  %v551_v49 = vshrl.u32 %v483_v33, 16  ;;  %v486_v52 = vld [vmem:[%s3816_s30 + $0x2c] sm:$0x1] }
  0x1b   : > { %3392 = vmatmul.mubr.msk.bf16.gmra.mrb[4].mxu0 %vm293_vm1, %v3652_v8  ;;  %v502_v41 = vrot.slane %v501_v29, 4  ;;  %v516_v46 = vrot.slane %v515_v36, 4  ;;  %v546_v51 = vshll.u32 %v482_v37, 16  ;;  %v554_v53 = vshll.u32 %v483_v33, 16  ;;  %v487_v59 = vld [vmem:[%s3816_s30 + $0x30] sm:$0xf] }
  0x1c   : > { %3397 = vmatprep.mubr.msk.bf16.mxu0 %vm293_vm1, %v3653_v9  ;;  %v529_v56 = vor.u32 %v528_v39, %v525_v38  ;;  %v553_v57 = vrot.slane %v551_v49, 4  ;;  %v565_v58 = vshrl.u32 %v485_v45, 16  ;;  %v543_v61 = vor.u32 %v542_v44, %v539_v43  ;;  %v489_v0 = vld [vmem:[%s3816_s30 + $0x38] sm:$0xf]  ;;  %v488_v13 = vld [vmem:[%s3816_s30 + $0x34] sm:$0x1] }
  0x1d   : > { %v507_v54 = vsel %vm3846_vm4, %v502_v41, %v506_v35  ;;  %v521_v60 = vsel %vm3846_vm4, %v516_v46, %v520_v42  ;;  %v556_v62 = vrot.slane %v554_v53, 5  ;;  %v560_v63 = vshll.u32 %v484_v48, 16  ;;  %v3656_v5 = vld [vmem:[%s3816_s30 + $0x30] ss:$8 sps:$4 sm:$0xff]   ;;  %v490_v19 = vld [vmem:[%s3816_s30 + $0x3c] sm:$0x1] }
  0x1e   : > { %v534_v1 = vrot.slane %v532_v47, 5  ;;  %v567_v2 = vrot.slane %v565_v58, 4  ;;  %v568_v3 = vshll.u32 %v485_v45, 16  ;;  %v574_v4 = vshll.u32 %v486_v52, 16  ;;  %v2986_v43 = vld [vmem:[%s3816_s30 + $0x90] sm:$0xf] }
  0x1f   : > { %v548_v6 = vrot.slane %v546_v51, 5  ;;  %v557_v7 = vor.u32 %v556_v62, %v553_v57  ;;  %v579_v8 = vshrl.u32 %v487_v59, 16  ;;  %v582_v9 = vshll.u32 %v487_v59, 16  ;;  %v2977_v44 = vld [vmem:[%s4601_s1 + $0x8] sm:$0x3] }
  0x20   : > { %v2944_v10 = vcombine.low %v507_v54, %v521_v60  ;;  %v530_v11 = vrot.slane %v529_v56, 4  ;;  %v570_v12 = vrot.slane %v568_v3, 5  ;;  %v544_v14 = vrot.slane %v543_v61, 4  ;;  %v2988_v45 = vld [vmem:[%s3816_s30 + $0x98] sm:$0xf] }
  0x21   : > { %v562_v15 = vrot.slane %v560_v63, 5  ;;  %v576_v16 = vrot.slane %v574_v4, 5  ;;  %v593_v17 = vshrl.u32 %v489_v0, 16  ;;  %v581_v20 = vrot.slane %v579_v8, 4  ;;  %v3898_v51 = vld [vmem:[%s4601_s1 + $0xa] sm:$0x3] }
  0x22   : > { %v571_v18 = vor.u32 %v570_v12, %v567_v2  ;;  %v584_v21 = vrot.slane %v582_v9, 5  ;;  %v596_v22 = vshll.u32 %v489_v0, 16  ;;  %v558_v23 = vrot.slane %v557_v7, 4  ;;  %v2990_v54 = vld [vmem:[%s3816_s30 + $0xa0] sm:$0xf] }
  0x23   : > { %3398 = vmatmul.mubr.msk.bf16.vlgmr.msra.gmra.mrb[0].mxu0 %vm293_vm1, %v3654_v28  ;;  %v595_v24 = vrot.slane %v593_v17, 4  ;;  %v535_v27 = vsel %vm3846_vm4, %v530_v11, %v534_v1  ;;  %v588_v28 = vshll.u32 %v488_v13, 16  ;;  %v549_v29 = vsel %vm3846_vm4, %v544_v14, %v548_v6  ;;  %v3904_v56 = vld [vmem:[%s4601_s1 + $0xc] sm:$0x3]  ;;  %v2992_v57 = vld [vmem:[%s3816_s30 + $0xa8] sm:$0xf] }
  0x24   : > { %3406 = vmatpush3.bf16.msra.mxu0 %v633_v50  ;;  %3401 = vmatprep.mubr.msk.bf16.mxu0 %vm293_vm1, %v3655_v34  ;;  %v572_v25 = vrot.slane %v571_v18, 4  ;;  %v598_v26 = vrot.slane %v596_v22, 5  ;;  %v585_v30 = vor.u32 %v584_v21, %v581_v20  ;;  %v602_v32 = vshll.u32 %v490_v19, 16  ;;  %v3910_v58 = vld [vmem:[%s4601_s1 + $0xe] sm:$0x3] }
  0x25   : > { %3632 = vmatprep.subr.msk.bf16.mxu0 %vm306_vm0, %v2960_v55  ;;  %v563_v33 = vsel %vm3846_vm4, %v558_v23, %v562_v15  ;;  %v2945_v35 = vcombine.low %v535_v27, %v549_v29  ;;  %v590_v36 = vrot.slane %v588_v28, 5  ;;  %v752_v42 = vsel %vm306_vm0, %v2960_v55, 0  ;;  %v3657_v59 = vld [vmem:[%s3816_s30 + $0x90] ss:$8 sps:$4 sm:$0xff]   ;;  %v2987_v60 = vld [vmem:[%s3816_s30 + $0x94] sm:$0x1] }
  0x26   : > { %v599_v31 = vor.u32 %v598_v26, %v595_v24  ;;  %v577_v34 = vsel %vm3846_vm4, %v572_v25, %v576_v16  ;;  %v586_v38 = vrot.slane %v585_v30, 4  ;;  %v604_v41 = vrot.slane %v602_v32, 5  ;;  %v3917_v63 = vld [vmem:[%s4601_s1 + $0x10] sm:$0x3]  ;;  %v2989_v0 = vld [vmem:[%s3816_s30 + $0x9c] sm:$0x1] }
  0x27   : > { %v2946_v37 = vcombine.low %v563_v33, %v577_v34  ;;  %v963_v48 = vshrl.u32 %v2986_v43, 16  ;;  %v966_v49 = vshll.u32 %v2986_v43, 16  ;;  %v3893_v50 = vsel %vm306_vm0, %v2977_v44, 0  ;;  %v2991_v1 = vld [vmem:[%s3816_s30 + $0xa4] sm:$0x1] }
  0x28   : > { %v600_v39 = vrot.slane %v599_v31, 4  ;;  %v591_v46 = vsel %vm3846_vm4, %v586_v38, %v590_v36  ;;  %v977_v52 = vshrl.u32 %v2988_v45, 16  ;;  %v980_v53 = vshll.u32 %v2988_v45, 16  ;;  %v2993_v6 = vld [vmem:[%s3816_s30 + $0xac] sm:$0x1] }
  0x29   : > { %v965_v61 = vrot.slane %v963_v48, 4  ;;  %v968_v62 = vrot.slane %v966_v49, 5  ;;  %v991_v2 = vshrl.u32 %v2990_v54, 16  ;;  %v994_v3 = vshll.u32 %v2990_v54, 16  ;;  %v2994_v12 = vld [vmem:[%s3816_s30 + $0xb0] sm:$0xf] }
  0x2a   : > { %v605_v47 = vsel %vm3846_vm4, %v600_v39, %v604_v41  ;;  %v979_v4 = vrot.slane %v977_v52, 4  ;;  %v1005_v7 = vshrl.u32 %v2992_v57, 16  ;;  %v1008_v8 = vshll.u32 %v2992_v57, 16  ;;  %v2996_v17 = vld [vmem:[%s3816_s30 + $0xb8] sm:$0xf] }
  0x2b   : > { %3402 = vmatmul.mubr.msk.bf16.gmra.mrb[4].mxu0 %vm293_vm1, %v3656_v5  ;;  %v2947_v55 = vcombine.low %v591_v46, %v605_v47  ;;  %v982_v5 = vrot.slane %v980_v53, 5  ;;  %v3925_v9 = vsel %vm306_vm0, %v3898_v51, 0  ;;  %v3929_v11 = vsel %vm306_vm0, %v3904_v56, 0  ;;  %v3658_v18 = vld [vmem:[%s3816_s30 + $0xa0] ss:$8 sps:$4 sm:$0xff]  }
  0x2c   : > { %3407 = vmatprep.mubr.msk.bf16.mxu0 %vm293_vm1, %v2944_v10  ;;  %v972_v10 = vshll.u32 %v2987_v60, 16  ;;  %v3934_v13 = vsel %vm306_vm0, %v3910_v58, 0  ;;  %v969_v14 = vor.u32 %v968_v62, %v965_v61  ;;  %v986_v15 = vshll.u32 %v2989_v0, 16  ;;  %v3659_v23 = vld [vmem:[%s3816_s30 + $0xb0] ss:$8 sps:$4 sm:$0xff]  }
  0x2d   : > { %v1000_v16 = vshll.u32 %v2991_v1, 16  ;;  %v993_v19 = vrot.slane %v991_v2, 4  ;;  %v996_v20 = vrot.slane %v994_v3, 5  ;;  %v1014_v21 = vshll.u32 %v2993_v6, 16  ;;  %v2995_v27 = vld [vmem:[%s3816_s30 + $0xb4] sm:$0x1] }
  0x2e   : > { %v3941_v22 = vsel %vm306_vm0, %v3917_v63, 0  ;;  %v983_v24 = vor.u32 %v982_v5, %v979_v4  ;;  %v1007_v25 = vrot.slane %v1005_v7, 4  ;;  %v1010_v26 = vrot.slane %v1008_v8, 5  ;;  %v2998_v28 = vld [vmem:[%s3816_s30 + $0xc0] sm:$0xf] }
  0x2f   : > { %v3946_v29 = vrot.slane %v972_v10, 5  ;;  %v1019_v30 = vshrl.u32 %v2994_v12, 16  ;;  %v1022_v31 = vshll.u32 %v2994_v12, 16  ;;  %v1033_v32 = vshrl.u32 %v2996_v17, 16  ;;  %v2997_v36 = vld [vmem:[%s3816_s30 + $0xbc] sm:$0x1] }
  0x30   : > { %v3948_v33 = vrot.slane %v969_v14, 4  ;;  %v3950_v34 = vrot.slane %v986_v15, 5  ;;  %v3000_v38 = vld [vmem:[%s3816_s30 + $0xc8] sm:$0xf]  ;;  %v1047_v39 = vshrl.u32 %v2998_v28, 16  ;;  %v1050_v41 = vshll.u32 %v2998_v28, 16 }
  0x31   : > { %v997_v43 = vor.u32 %v996_v20, %v993_v19  ;;  %v3958_v45 = vrot.slane %v1014_v21, 5  ;;  %v2999_v46 = vld [vmem:[%s3816_s30 + $0xc4] sm:$0x1]  ;;  %v1021_v47 = vrot.slane %v1019_v30, 4  ;;  %v1024_v48 = vrot.slane %v1022_v31, 5 }
  0x32   : > { %v1028_v49 = vshll.u32 %v2995_v27, 16  ;;  %v1035_v52 = vrot.slane %v1033_v32, 4  ;;  %v1042_v54 = vshll.u32 %v2997_v36, 16  ;;  %v1061_v57 = vshrl.u32 %v3000_v38, 16  ;;  %v3660_v60 = vld [vmem:[%s3816_s30 + $0xc0] ss:$8 sps:$4 sm:$0xff]  }
  0x33   : > { %3408 = vmatmul.mubr.msk.bf16.vlgmr.msra.gmra.mrb[0].mxu0 %vm293_vm1, %v2945_v35  ;;  %v3952_v35 = vrot.slane %v1000_v16, 5  ;;  %v1049_v61 = vrot.slane %v1047_v39, 4  ;;  %v1052_v62 = vrot.slane %v1050_v41, 5  ;;  %v3661_v0 = vld [vmem:[%s3816_s30 + $0xd8] ss:$8 sps:$4 sm:$0xff]   ;;  %v3969_v1 = vrot.slane %v997_v43, 4 }
  0x34   : > { %3416 = vmatpush3.bf16.msra.mxu0 %v752_v42  ;;  %3411 = vmatprep.mubr.msk.bf16.mxu0 %vm293_vm1, %v2946_v37  ;;  %v1036_v37 = vshll.u32 %v2996_v17, 16  ;;  %v3956_v42 = vrot.slane %v983_v24, 4  ;;  %v1025_v2 = vor.u32 %v1024_v48, %v1021_v47  ;;  %v3973_v3 = vrot.slane %v1028_v49, 5  ;;  %v3045_v12 = vld [vmem:[%s3816_s30 + $0x8] sm:$0xf] }
  0x35   : > { %3633 = vmatprep.subr.msk.bf16.mxu0 %vm306_vm0, %v2977_v44  ;;  %v1011_v44 = vor.u32 %v1010_v26, %v1007_v25  ;;  %v1056_v4 = vshll.u32 %v2999_v46, 16  ;;  %v1063_v5 = vrot.slane %v1061_v57, 4  ;;  %v3975_v8 = vrot.slane %v1042_v54, 5  ;;  %v3046_v14 = vld [vmem:[%s3816_s30 + $0xc] sm:$0x1] }
  0x36   : > { %v1038_v53 = vrot.slane %v1036_v37, 5  ;;  %v3047_v15 = vld [vmem:[%s3816_s30 + $0x10] sm:$0xf]  ;;  %v3048_v16 = vld [vmem:[%s3816_s30 + $0x14] sm:$0x1]  ;;  %v1431_v17 = vshrl.u32 %v3045_v12, 16 }
  0x37   : > { %v3982_v19 = vrot.slane %v1025_v2, 4  ;;  %v3984_v20 = vrot.slane %v1056_v4, 5  ;;  %v1445_v21 = vshrl.u32 %v3047_v15, 16  ;;  %v3049_v24 = vld [vmem:[%s3816_s30 + $0x18] sm:$0xf]  ;;  %v1440_v28 = vshll.u32 %v3046_v14, 16 }
  0x38   : > { %v1039_v7 = vor.u32 %v1038_v53, %v1035_v52  ;;  %v1433_v26 = vrot.slane %v1431_v17, 4  ;;  %v3051_v30 = vld [vmem:[%s3816_s30 + $0x20] sm:$0xf]  ;;  %v3662_v31 = vld [vmem:[%s3816_s30 + $0xe8] ss:$8 sps:$4 sm:$0xff]   ;;  %v1459_v46 = vshrl.u32 %v3049_v24, 16  ;;  %v989_v14 = vsel %vm3846_vm4, %v3956_v42, %v3950_v34 }
  0x39   : > { %v3663_v39 = vld [vmem:[%s3816_s30 + $0xf8] ss:$8 sps:$4 sm:$0xff]   ;;  %v1447_v41 = vrot.slane %v1445_v21, 4  ;;  %v1462_v47 = vshll.u32 %v3049_v24, 16  ;;  %v3052_v49 = vld [vmem:[%s3816_s30 + $0x24] sm:$0x1] }
  0x3a   : > { %v3990_v32 = vrot.slane %v1039_v7, 4  ;;  %v1473_v52 = vshrl.u32 %v3051_v30, 16  ;;  %v1476_v53 = vshll.u32 %v3051_v30, 16  ;;  %v3053_v54 = vld [vmem:[%s3816_s30 + $0x28] sm:$0xf]  ;;  %v4002_v57 = vrot.slane %v1440_v28, 5 }
  0x3b   : > { %3412 = vmatmul.mubr.msk.bf16.gmra.mrb[4].mxu0 %vm293_vm1, %v2947_v55  ;;  %v3001_v55 = vld [vmem:[%s3816_s30 + $0xcc] sm:$0x1]  ;;  %v3664_v34 = vld [vmem:[%s3816_s30 + $0x108] ss:$8 sps:$4 sm:$0xff]  }
  0x3c   : > { %3417 = vmatprep.mubr.msk.bf16.mxu0 %vm293_vm1, %v3657_v59  ;;  %v1064_v59 = vshll.u32 %v3000_v38, 16  ;;  %v1070_v10 = vshll.u32 %v3001_v55, 16  ;;  %v1454_v38 = vshll.u32 %v3048_v16, 16  ;;  %v1475_v2 = vrot.slane %v1473_v52, 4  ;;  %v3054_v7 = vld [vmem:[%s3816_s30 + $0x2c] sm:$0x1] }
  0x3d   : > { %v1478_v4 = vrot.slane %v1476_v53, 5  ;;  %v3056_v16 = vld [vmem:[%s3816_s30 + $0x34] sm:$0x1] }
  0x3e   : > { %v1066_v6 = vrot.slane %v1064_v59, 5  ;;  %v3994_v37 = vrot.slane %v1070_v10, 5  ;;  %v1461_v59 = vrot.slane %v1459_v46, 4  ;;  %v1490_v10 = vshll.u32 %v3053_v54, 16 }
  0x40   : > { %v1067_v25 = vor.u32 %v1066_v6, %v1063_v5  ;;  %v1482_v6 = vshll.u32 %v3052_v49, 16  ;;  %v3059_v49 = vld [vmem:[%s3816_s30 + $0x40] sm:$0xf] }
  0x42   : > { %v4000_v55 = vrot.slane %v1067_v25, 4  ;;  %v1492_v25 = vrot.slane %v1490_v10, 5 }
  0x43   : > { %3418 = vmatmul.mubr.msk.bf16.vlgmr.msra.gmra.mrb[0].mxu0 %vm293_vm1, %v3658_v18  ;;  %v1434_v18 = vshll.u32 %v3045_v12, 16  ;;  %v975_v12 = vsel %vm3846_vm4, %v3948_v33, %v3946_v29  ;;  %v4024_v29 = vld [vmem:[%s3816_s30 + $0x3c] sm:$0x1]  ;;  %v1989_v33 = vld [vmem:[%s4605_s5] sm:$0x3] }
  0x44   : > { %3426 = vmatpush3.bf16.msra.mxu0 %v3893_v50  ;;  %3421 = vmatprep.mubr.msk.bf16.mxu0 %vm293_vm1, %v3659_v23  ;;  %v3971_v50 = vrot.slane %v1011_v44, 4  ;;  %v1448_v23 = vshll.u32 %v3047_v15, 16  ;;  %v3050_v44 = vld [vmem:[%s3816_s30 + $0x1c] sm:$0x1]  ;;  %v3003_v46 = vcombine.low %v975_v12, %v989_v14  ;;  %v1529_v12 = vshrl.u32 %v3059_v49, 16 }
  0x45   : > { %3634 = vmatprep.subr.msk.bf16.mxu0 %vm306_vm0, %v3898_v51  ;;  %v1053_v51 = vor.u32 %v1052_v62, %v1049_v61  ;;  %v1436_v27 = vrot.slane %v1434_v18, 5  ;;  %v3055_v61 = vld [vmem:[%s3816_s30 + $0x30] sm:$0xf]  ;;  %v4005_v62 = vrot.slane %v1454_v38, 5  ;;  %v3057_v18 = vld [vmem:[%s3816_s30 + $0x38] sm:$0xf]  ;;  %3638 = vmatprep.subr.msk.bf16.mxu1 %vm306_vm0, %v1989_v33 }
  0x46   : > { %v1450_v43 = vrot.slane %v1448_v23, 5  ;;  %v1501_v17 = vshrl.u32 %v3055_v61, 16  ;;  %v1479_v23 = vor.u32 %v1478_v4, %v1475_v2  ;;  %v3673_v38 = vld [vmem:[%s3816_s30 + $0xd8] ss:$8 sps:$4 sm:$0xff]   ;;  %v2023_v2 = vsel %vm306_vm0, %v1989_v33, 0 }
  0x47   : > { %v3992_v36 = vrot.slane %v1053_v51, 4  ;;  %v1437_v48 = vor.u32 %v1436_v27, %v1433_v26  ;;  %v1487_v51 = vshrl.u32 %v3053_v54, 16  ;;  %v1504_v27 = vshll.u32 %v3055_v61, 16  ;;  %3477 = vmatprep.mubr.msk.bf16.mxu1 %vm293_vm1, %v3673_v38  ;;  %v3676_v61 = vld [vmem:[%s4604_s4] sm:$0xff]   ;;  %v3674_v4 = vld [vmem:[%s3816_s30 + $0xe8] ss:$8 sps:$4 sm:$0xff]   ;;  %3476 = vmatpush3.bf16.msra.mxu1 %v2023_v2 }
  0x48   : > { %v1451_v5 = vor.u32 %v1450_v43, %v1447_v41  ;;  %v1503_v26 = vrot.slane %v1501_v17, 4  ;;  %v4041_v41 = vrot.slane %v1482_v6, 5  ;;  %v1515_v43 = vshrl.u32 %v3057_v18, 16  ;;  %v3671_v33 = vld [vmem:[%s3816_s30 + $0x70] ss:$8 sps:$4 sm:$0xff]  }
  0x49   : > { %v4017_v15 = vrot.slane %v1437_v48, 4  ;;  %v1489_v24 = vrot.slane %v1487_v51, 4  ;;  %v4045_v48 = vrot.slane %v1479_v23, 4  ;;  %v1003_v51 = vsel %vm3846_vm4, %v3969_v1, %v3952_v35  ;;  %v3695_v2 = vld [vmem:[%s4604_s4 + $0x30] sm:$0xff]  }
  0x4a   : > { %v4035_v28 = vrot.slane %v1451_v5, 4  ;;  %v3677_v5 = vld [vmem:[%s4604_s4 + $0x48] sm:$0xff]   ;;  %v4068_v6 = vrot.slane %v1515_v43, 4  ;;  %v1017_v10 = vsel %vm3846_vm4, %v3971_v50, %v3958_v45  ;;  %v1532_v14 = vshll.u32 %v3059_v49, 16  ;;  %3478 = vmatmul.mubr.msk.bf16.vlgmr.msra.gmra.mrb[0].mxu1 %vm293_vm1, %v3674_v4  ;;  %v3679_v50 = vld [vmem:[%s4604_s4 + $0x50] sm:$0xff]   ;;  %v3687_v49 = vld [vmem:[%s4604_s4 + $0x20] sm:$0xff]  }
  0x4b   : > { %3422 = vmatmul.mubr.msk.bf16.gmra.mrb[4].mxu0 %vm293_vm1, %v3660_v60  ;;  %v1464_v60 = vrot.slane %v1462_v47, 5  ;;  %v1493_v30 = vor.u32 %v1492_v25, %v1489_v24  ;;  %v1045_v17 = vsel %vm3846_vm4, %v3990_v32, %v3975_v8  ;;  %v3678_v45 = vld [vmem:[%s4604_s4 + $0x8] sm:$0xff]   ;;  %v3004_v1 = vcombine.low %v1003_v51, %v1017_v10  ;;  %v3681_v8 = vld [vmem:[%s4604_s4 + $0x10] sm:$0xff]   ;;  %v3682_v32 = vld [vmem:[%s4604_s4 + $0x58] sm:$0xff]  }
  0x4c   : > { %3427 = vmatprep.mubr.msk.bf16.mxu0 %vm293_vm1, %v3661_v0  ;;  %v1468_v0 = vshll.u32 %v3050_v44, 16  ;;  %v1518_v44 = vshll.u32 %v3057_v18, 16  ;;  %v1059_v23 = vsel %vm3846_vm4, %v3992_v36, %v3984_v20  ;;  %v1073_v24 = vsel %vm3846_vm4, %v4000_v55, %v3994_v37  ;;  %v3665_v25 = vld [vmem:[%s3816_s30 + $0x8] ss:$8 sps:$4 sm:$0xff]   ;;  %v3666_v20 = vld [vmem:[%s3816_s30 + $0x18] ss:$8 sps:$4 sm:$0xff]  }
  0x4d   : > { %v1465_v21 = vor.u32 %v1464_v60, %v1461_v59  ;;  %v4049_v52 = vrot.slane %v1493_v30, 4  ;;  %v4054_v59 = vld [vmem:[%s3816_s30 + $0x44] sm:$0x1]  ;;  %v1524_v60 = vshll.u32 %v4024_v29, 16  ;;  %v3667_v36 = vld [vmem:[%s3816_s30 + $0x28] ss:$8 sps:$4 sm:$0xff]  }
  0x4e   : > { %v4032_v42 = vrot.slane %v1468_v0, 5  ;;  %v1538_v35 = vshll.u32 %v4054_v59, 16  ;;  %v3669_v37 = vld [vmem:[%s3816_s30 + $0x50] ss:$8 sps:$4 sm:$0xff]   ;;  %v3670_v55 = vld [vmem:[%s3816_s30 + $0x60] ss:$8 sps:$4 sm:$0xff]  }
  0x4f   : > { %v4043_v47 = vrot.slane %v1465_v21, 4  ;;  %v1534_v21 = vrot.slane %v1532_v14, 5  ;;  %v3691_v59 = vld [vmem:[%s3816_s30 + $0xf8] ss:$8 sps:$4 sm:$0xff]   ;;  %v4271_v51 = vld [vmem:[%s4604_s4 + $0x230] sm:$0xff]  }
  0x50   : > { %3481 = vmatprep.mubr.msk.bf16.mxu1 %vm293_vm1, %v3691_v59  ;;  %v3696_v4 = vld [vmem:[%s4604_s4 + $0x78] sm:$0xff]  }
  0x51   : > { %v4278_v10 = vld [vmem:[%s4604_s4 + $0x238] sm:$0xff]  }
  0x53   : > { %3428 = vmatmul.mubr.msk.bf16.vlgmr.msra.gmra.mrb[0].mxu0 %vm293_vm1, %v3662_v31  ;;  %v1510_v31 = vshll.u32 %v3056_v16, 16  ;;  %v1031_v16 = vsel %vm3846_vm4, %v3982_v19, %v3973_v3  ;;  %v1531_v19 = vrot.slane %v1529_v12, 4  ;;  %v3070_v12 = vld [vmem:[%s4602_s2] ss:$0 sm:$0xff] }
  0x54   : > { %3436 = vmatpush3.bf16.msra.mxu0 %v3925_v9  ;;  %3431 = vmatprep.mubr.msk.bf16.mxu0 %vm293_vm1, %v3663_v39  ;;  %v1496_v9 = vshll.u32 %v3054_v7, 16  ;;  %v3675_v39 = vld [vmem:[%s4604_s4 + $0x40] sm:$0xff]   ;;  %v4070_v7 = vrot.slane %v1518_v44, 5  ;;  %v3005_v3 = vcombine.low %v1031_v16, %v1045_v17 }
  0x55   : > { %3635 = vmatprep.subr.msk.bf16.mxu0 %vm306_vm0, %v3904_v56  ;;  %v1506_v56 = vrot.slane %v1504_v27, 5  ;;  %v4060_v0 = vrot.slane %v1510_v31, 5  ;;  %3213 = vmatprep.subr.bf16.mxu1 %v3675_v39  ;;  %v3071_v16 = vld [vmem:[%s4603_s3] ss:$0 sm:$0xff] }
  0x56   : > { %v4051_v53 = vrot.slane %v1496_v9, 5  ;;  %3214 = vmatpush3.bf16.msra.mxu1 %v3676_v61  ;;  %v1457_v9 = vsel %vm3846_vm4, %v4035_v28, %v4005_v62  ;;  %v1521_v62 = vor.u32 %v4070_v7, %v4068_v6  ;;  %v3692_v61 = vld [vmem:[%s4604_s4 + $0x70] sm:$0xff]   ;;  %v3698_v6 = vld [vmem:[%s4604_s4 + $0x38] sm:$0xff]   ;;  %v3699_v7 = vld [vmem:[%s4604_s4 + $0xc0] sm:$0xff]  }
  0x57   : > { %v1507_v54 = vor.u32 %v1506_v56, %v1503_v26  ;;  %3215 = vmatprep.subr.bf16.mxu1 %v3677_v5  ;;  %v4174_v56 = vld [vmem:[%s4604_s4 + $0x208] sm:$0xff]  }
  0x58   : > { %v1499_v27 = vsel %vm3846_vm4, %v4049_v52, %v4051_v53  ;;  %v1522_v38 = vrot.slane %v1521_v62, 4  ;;  %v3688_v52 = vld [vmem:[%s4604_s4 + $0x68] sm:$0xff]   ;;  %v4228_v53 = vld [vmem:[%s4604_s4 + $0x218] sm:$0xff]  }
  0x59   : > { %v1508_v18 = vrot.slane %v1507_v54, 4  ;;  %v3690_v54 = vld [vmem:[%s4604_s4 + $0x28] sm:$0xff]  }
  0x5a   : > { %3216 = vmatpush3.bf16.msra.mxu1 %v3678_v45  ;;  %v4258_v5 = vld [vmem:[%s4604_s4 + $0x228] sm:$0xff]  }
  0x5b   : > { %3432 = vmatmul.mubr.msk.bf16.gmra.mrb[4].mxu0 %vm293_vm1, %v3664_v34  ;;  %3217 = vmatprep.subr.bf16.mxu1 %v3679_v50  ;;  %v4135_v34 = vld [vmem:[%s4604_s4 + $0x200] sm:$0xff]   ;;  %v1513_v28 = vsel %vm3846_vm4, %v1508_v18, %v4060_v0 }
  0x5c   : > { %3437 = vmatprep.mubr.msk.bf16.mxu0 %vm293_vm1, %v3003_v46  ;;  %v3064_v31 = vcombine.low %v1499_v27, %v1513_v28  ;;  %v3684_v46 = vld [vmem:[%s4604_s4 + $0x18] sm:$0xff]   ;;  %v4244_v0 = vld [vmem:[%s4604_s4 + $0x220] sm:$0xff]  }
  0x5e   : > { %3218 = vmatpush3.bf16.msra.mxu1 %v3681_v8 }
  0x5f   : > { %3219 = vmatprep.subr.bf16.mxu1 %v3682_v32 }
  0x62   : > { %3220 = vmatpush3.bf16.msra.mxu1 %v3684_v46 }
  0x63   : > { %3438 = vmatmul.mubr.msk.bf16.vlgmr.msra.gmra.mrb[0].mxu0 %vm293_vm1, %v3004_v1 }
  0x64   : > { %3446 = vmatpush3.bf16.msra.mxu0 %v3929_v11  ;;  %3441 = vmatprep.mubr.msk.bf16.mxu0 %vm293_vm1, %v3005_v3  ;;  %v3006_v11 = vcombine.low %v1059_v23, %v1073_v24 }
  0x65   : > { %3636 = vmatprep.subr.msk.bf16.mxu0 %vm306_vm0, %v3910_v58  ;;  %v3668_v58 = vld [vmem:[%s3816_s30 + $0x38] ss:$8 sps:$4 sm:$0xff]  }
  0x6b   : > { %3442 = vmatmul.mubr.msk.bf16.gmra.mrb[4].mxu0 %vm293_vm1, %v3006_v11 }
  0x6c   : > { %3447 = vmatprep.mubr.msk.bf16.mxu0 %vm293_vm1, %v3665_v25 }
  0x73   : > { %3448 = vmatmul.mubr.msk.bf16.vlgmr.msra.gmra.mrb[0].mxu0 %vm293_vm1, %v3666_v20 }
  0x74   : > { %3456 = vmatpush3.bf16.msra.mxu0 %v3934_v13  ;;  %3451 = vmatprep.mubr.msk.bf16.mxu0 %vm293_vm1, %v3667_v36  ;;  %v3672_v13 = vld [vmem:[%s3816_s30 + $0x80] ss:$8 sps:$4 sm:$0xff]  }
  0x75   : > { %3637 = vmatprep.subr.msk.bf16.mxu0 %vm306_vm0, %v3917_v63  ;;  %v1443_v63 = vsel %vm3846_vm4, %v4017_v15, %v4002_v57  ;;  %v1485_v57 = vsel %vm3846_vm4, %v4045_v48, %v4041_v41  ;;  %v1535_v15 = vor.u32 %v1534_v21, %v1531_v19  ;;  %v1540_v41 = vrot.slane %v1538_v35, 5 }
  0x76   : > { %v3062_v26 = vcombine.low %v1443_v63, %v1457_v9  ;;  %v3757_v48 = vmov 0.0  }
  0x77   : > { %v1536_v39 = vrot.slane %v1535_v15, 4  ;;  %1698 = vst [vmem:[#allocation2] sm:$0xff] %v3757_v48  ;;  %1699 = vst [vmem:[#allocation2 + $0x8] sm:$0x3] %v3757_v48 }
  0x78   : > { %1701 = vst [vmem:[#allocation2 + $0x90] sm:$0xff] %v3757_v48  ;;  %1702 = vst [vmem:[#allocation2 + $0x98] sm:$0x3] %v3757_v48 }
  0x79   : > { %v1541_v29 = vsel %vm3846_vm4, %v1536_v39, %v1540_v41  ;;  %1704 = vst [vmem:[#allocation2 + $0x10] sm:$0x1] %v3757_v48  ;;  %1705 = vst [vmem:[#allocation2 + $0x20] sm:$0x1] %v3757_v48 }
  0x7a   : > { %1706 = vst [vmem:[#allocation2 + $0x30] sm:$0x1] %v3757_v48  ;;  %1707 = vst [vmem:[#allocation2 + $0x40] sm:$0x1] %v3757_v48 }
  0x7b   : > { %3452 = vmatmul.mubr.msk.bf16.gmra.mrb[4].mxu0 %vm293_vm1, %v3668_v58  ;;  %1708 = vst [vmem:[#allocation2 + $0x50] sm:$0x1] %v3757_v48  ;;  %1709 = vst [vmem:[#allocation2 + $0x60] sm:$0x1] %v3757_v48 }
  0x7c   : > { %3457 = vmatprep.mubr.msk.bf16.mxu0 %vm293_vm1, %v3669_v37  ;;  %1710 = vst [vmem:[#allocation2 + $0x70] sm:$0x1] %v3757_v48  ;;  %1711 = vst [vmem:[#allocation2 + $0x80] sm:$0x1] %v3757_v48 }
  0x7d   : > { %1712 = vst [vmem:[#allocation2 + $0x19] sm:$0x1] %v3757_v48  ;;  %1713 = vst [vmem:[#allocation2 + $0x29] sm:$0x1] %v3757_v48 }
  0x7e   : > { %1714 = vst [vmem:[#allocation2 + $0x39] sm:$0x1] %v3757_v48  ;;  %1715 = vst [vmem:[#allocation2 + $0x49] sm:$0x1] %v3757_v48  ;;  %v1740_v25 = vld [vmem:[#allocation2 + $0x1] sm:$0xff] }
  0x7f   : > { %1716 = vst [vmem:[#allocation2 + $0x59] sm:$0x1] %v3757_v48  ;;  %1717 = vst [vmem:[#allocation2 + $0x69] sm:$0x1] %v3757_v48 }
  0x80   : > { %1718 = vst [vmem:[#allocation2 + $0x79] sm:$0x1] %v3757_v48  ;;  %1719 = vst [vmem:[#allocation2 + $0x89] sm:$0x1] %v3757_v48 }
  0x83   : > { %3458 = vmatmul.mubr.msk.bf16.vlgmr.msra.gmra.mrb[0].mxu0 %vm293_vm1, %v3670_v55 }
  0x84   : > { %3466 = vmatpush3.bf16.msra.mxu0 %v3941_v22  ;;  %3461 = vmatprep.mubr.msk.bf16.mxu0 %vm293_vm1, %v3671_v33  ;;  %v1471_v22 = vsel %vm3846_vm4, %v4043_v47, %v4032_v42  ;;  %v1526_v42 = vrot.slane %v1524_v60, 5  ;;  %v3685_v47 = vld [vmem:[%s4604_s4 + $0x60] sm:$0xff]   ;;  %v3694_v60 = vld [vmem:[%s3816_s30 + $0x108] ss:$8 sps:$4 sm:$0xff]   ;;  %s3162_s30 = sshll.u32 %s4610_s22, 6 }
  0x85   : > { %3485 = vmatprep.subr.bf16.mxu0 %v4135_v34  ;;  %v3063_v30 = vcombine.low %v1471_v22, %v1485_v57  ;;  %3221 = vmatprep.subr.bf16.mxu1 %v3685_v47  ;;  %s4583_s23 = scalar_lea.vmem %s4606_s6, %s3162_s30 }
  0x86   : > { %v1527_v43 = vsel %vm3846_vm4, %v1522_v38, %v1526_v42  ;;  %3222 = vmatpush3.bf16.msra.mxu1 %v3687_v49 }
  0x87   : > { %v3065_v44 = vcombine.low %v1527_v43, %v1541_v29  ;;  %3223 = vmatprep.subr.bf16.mxu1 %v3688_v52  ;;  %3482 = vmatmul.mubr.msk.bf16.gmra.mrb[4].mxu1 %vm293_vm1, %v3694_v60  ;;  %v3701_v52 = vld [vmem:[%s4604_s4 + $0x80] sm:$0xff]   ;;  %v3702_v60 = vld [vmem:[%s4604_s4 + $0xc8] sm:$0xff]  }
  0x8a   : > { %3224 = vmatpush3.bf16.msra.mxu1 %v3690_v54 }
  0x8b   : > { %3462 = vmatmul.mubr.msk.bf16.gmra.mrb[4].mxu0 %vm293_vm1, %v3672_v13  ;;  %3225 = vmatprep.subr.bf16.mxu1 %v3692_v61 }
  0x8c   : > { %3467 = vmatprep.mubr.msk.bf16.mxu0 %vm293_vm1, %v3062_v26 }
  0x8e   : > { %3226 = vmatpush3.bf16.msra.mxu1 %v3695_v2 }
  0x8f   : > { %3227 = vmatprep.subr.bf16.mxu1 %v3696_v4 }
  0x92   : > { %3228 = vmatpush3.bf16.msra.mxu1 %v3698_v6 }
  0x93   : > { %3468 = vmatmul.mubr.msk.bf16.vlgmr.msra.gmra.mrb[0].mxu0 %vm293_vm1, %v3063_v30  ;;  %3253 = vmatprep.subr.bf16.mxu1 %v3699_v7 }
  0x94   : > { %3471 = vmatprep.mubr.msk.bf16.mxu0 %vm293_vm1, %v3064_v31  ;;  %3486 = vmatpush3.bf16.msra.mxu0 %v4135_v34 }
  0x95   : > { %3487 = vmatprep.subr.bf16.mxu0 %v4174_v56 }
  0x98   : > { %3488 = vmatpush3.bf16.msra.mxu0 %v4174_v56 }
  0x99   : > { %3489 = vmatprep.subr.bf16.mxu0 %v4195_v40 }
  0x9b   : > { %3472 = vmatmul.mubr.msk.bf16.gmra.mrb[4].mxu0 %vm293_vm1, %v3065_v44 }
  0x9c   : > { %3490 = vmatpush3.bf16.msra.mxu0 %v4195_v40 }
  0x9d   : > { %3491 = vmatprep.subr.bf16.mxu0 %v4228_v53 }
  0xa0   : > { %3492 = vmatpush3.bf16.msra.mxu0 %v4228_v53 }
  0xa1   : > { %3493 = vmatprep.subr.bf16.mxu0 %v4244_v0 }
  0xa4   : > { %3494 = vmatpush3.bf16.msra.mxu0 %v4244_v0 }
  0xa5   : > { %3495 = vmatprep.subr.bf16.mxu0 %v4258_v5 }
  0xa8   : > { %3496 = vmatpush3.bf16.msra.mxu0 %v4258_v5 }
  0xa9   : > { %3497 = vmatprep.subr.bf16.mxu0 %v4271_v51 }
  0xac   : > { %3498 = vmatpush3.bf16.msra.mxu0 %v4271_v51 }
  0xad   : > { %3499 = vmatprep.subr.bf16.mxu0 %v4278_v10 }
  0xb0   : > { %3500 = vmatpush3.bf16.msra.mxu0 %v4278_v10 }
 0x166   : > { %v3469_v14 = vpop.f32.mrb[0].mxu0 }
 0x167   : > { %v1653_v17 = vmul.f32 %v3469_v14, %v3070_v12  ;;  %v1605_v18 = vpop.f32.mrb[1].mxu0 }
 0x168   : > { %v1651_v35 = vmul.f32 %v3070_v12, %v1605_v18  ;;  %v3470_v45 = vpop.f32.mrb[2].mxu0 }
 0x169   : > { %v1668_v1 = vadd.f32 %v3071_v16, %v1653_v17  ;;  %v1654_v50 = vmul.f32 %v3470_v45, %v3070_v12  ;;  %v1608_v3 = vpop.f32.mrb[3].mxu0  ;;  %v3704_v17 = vld [vmem:[%s4604_s4 + $0x88] sm:$0xff]   ;;  %v3705_v45 = vld [vmem:[%s4604_s4 + $0xd0] sm:$0xff]  }
 0x16a   : > { %v1666_v19 = vadd.f32 %v3071_v16, %v1651_v35  ;;  %v1652_v21 = vmul.f32 %v3070_v12, %v1608_v3 }
 0x16b   : > { %vm1676_vm5 = vcmp.ge.f32.partialorder %v1668_v1, 0.0  ;;  %v1684_v8 = vmul.f32 0.1, %v1668_v1  ;;  %v1669_v32 = vadd.f32 %v3071_v16, %v1654_v50 }
 0x16c   : > { %vm1674_vm6 = vcmp.ge.f32.partialorder %v1666_v19, 0.0  ;;  %v1682_v23 = vmul.f32 0.1, %v1666_v19  ;;  %v1667_v24 = vadd.f32 %v3071_v16, %v1652_v21 }
 0x16d   : > { %v4288_v11 = vsel %vm1676_vm5, %v1668_v1, %v1684_v8  ;;  %vm1677_vm7 = vcmp.ge.f32.partialorder %v1669_v32, 0.0  ;;  %v1685_v20 = vmul.f32 0.1, %v1669_v32 }
 0x16e   : > { %1722 = vst [vmem:[#allocation2 + $0x31] sm:$0xff] %v4288_v11  ;;  %v4291_v36 = vsel %vm1674_vm6, %v1666_v19, %v1682_v23  ;;  %vm1675_vm8 = vcmp.ge.f32.partialorder %v1667_v24, 0.0  ;;  %v1683_v58 = vmul.f32 0.1, %v1667_v24  ;;  %v3473_v37 = vpop.f32.mrb[4].mxu0  ;;  %v3706_v19 = vld [vmem:[%s4604_s4 + $0x90] sm:$0xff]  }
 0x16f   : > { %1720 = vst [vmem:[#allocation2 + $0x11] sm:$0xff] %v4291_v36  ;;  %v4294_v55 = vsel %vm1677_vm7, %v1669_v32, %v1685_v20  ;;  %v1657_v33 = vmul.f32 %v3473_v37, %v3070_v12  ;;  %v1621_v13 = vpop.f32.mrb[5].mxu0  ;;  %v1748_v63 = vpack.c.bf16 %v4291_v36, %v1740_v25  ;;  %v3707_v25 = vld [vmem:[%s4604_s4 + $0xd8] sm:$0xff]  }
 0x170   : > { %1723 = vst [vmem:[#allocation2 + $0x41] sm:$0xff] %v4294_v55  ;;  %v4298_v9 = vsel %vm1675_vm8, %v1667_v24, %v1683_v58  ;;  %v1655_v26 = vmul.f32 %v3070_v12, %v1621_v13  ;;  %v3474_v22 = vpop.f32.mrb[6].mxu0  ;;  %v1785_v57 = vpack.c.bf16 %v4294_v55, %v4288_v11  ;;  %v3708_v20 = vld [vmem:[%s4604_s4 + $0x98] sm:$0xff]   ;;  %v3709_v58 = vld [vmem:[%s4604_s4 + $0xe0] sm:$0xff]  }
 0x171   : > { %1721 = vst [vmem:[#allocation2 + $0x21] sm:$0xff] %v4298_v9  ;;  %v1672_v62 = vadd.f32 %v3071_v16, %v1657_v33  ;;  %v1658_v15 = vmul.f32 %v3474_v22, %v3070_v12  ;;  %v1624_v27 = vpop.f32.mrb[7].mxu0  ;;  %2554 = vmatprep.mubr.bf16.mxu1 %v1748_v63  ;;  %v4305_v28 = vpack.c.bf16 %v4288_v11, %v4298_v9  ;;  %v3710_v13 = vld [vmem:[%s4604_s4 + $0xa0] sm:$0xff]   ;;  %v3712_v22 = vld [vmem:[%s4604_s4 + $0xa8] sm:$0xff]  }
 0x172   : > { %v1784_v30 = vpack.c.bf16 %v4298_v9, %v4291_v36  ;;  %v1670_v42 = vadd.f32 %v3071_v16, %v1655_v26  ;;  %v1656_v31 = vmul.f32 %v3070_v12, %v1624_v27  ;;  %v3711_v26 = vld [vmem:[%s4604_s4 + $0xe8] sm:$0xff]   ;;  %v3739_v36 = vld [vmem:[%s4604_s4 + $0x1d8] sm:$0xff]  }
 0x173   : > { %vm1680_vm9 = vcmp.ge.f32.partialorder %v1672_v62, 0.0  ;;  %v1688_v38 = vmul.f32 0.1, %v1672_v62  ;;  %v1673_v39 = vadd.f32 %v3071_v16, %v1658_v15  ;;  %v3743_v11 = vld [vmem:[%s4604_s4 + $0x1e8] sm:$0xff]  }
 0x174   : > { %vm1678_vm10 = vcmp.ge.f32.partialorder %v1670_v42, 0.0  ;;  %v1686_v41 = vmul.f32 0.1, %v1670_v42  ;;  %v1671_v43 = vadd.f32 %v3071_v16, %v1656_v31  ;;  %v4349_v16 = vpop.f32.mrb[0].mxu1 }
 0x175   : > { %v4309_v29 = vsel %vm1680_vm9, %v1672_v62, %v1688_v38  ;;  %vm1681_vm11 = vcmp.ge.f32.partialorder %v1673_v39, 0.0  ;;  %v1689_v44 = vmul.f32 0.1, %v1673_v39  ;;  %v4336_v6 = vld [vmem:[#allocation2 + $0x32] sm:$0xff]  ;;  %v4357_v35 = vpop.f32.mrb[1].mxu1  ;;  %v3715_v38 = vld [vmem:[%s4604_s4 + $0xf8] sm:$0xff]  }
 0x176   : > { %1726 = vst [vmem:[#allocation2 + $0x71] sm:$0xff] %v4309_v29  ;;  %v4312_v46 = vsel %vm1678_vm10, %v1670_v42, %v1686_v41  ;;  %vm1679_vm12 = vcmp.ge.f32.partialorder %v1671_v43, 0.0  ;;  %v1687_v47 = vmul.f32 0.1, %v1671_v43  ;;  %v4314_v49 = vld [vmem:[#allocation2 + $0x10] sm:$0xff]  ;;  %v4363_v1 = vpop.f32.mrb[2].mxu1 }
 0x177   : > { %1724 = vst [vmem:[#allocation2 + $0x51] sm:$0xff] %v4312_v46  ;;  %v4320_v54 = vsel %vm1681_vm11, %v1673_v39, %v1689_v44  ;;  %v1736_v59 = vpack.c.bf16 %v4314_v49, %v3757_v48  ;;  %v4329_v61 = vpack.c.bf16 %v4312_v46, %v4294_v55  ;;  %v4365_v3 = vpop.f32.mrb[3].mxu1  ;;  %v4370_v21 = vld [vmem:[#allocation2 + $0x42] sm:$0xff]  ;;  %v1731_v32 = vld [vmem:[#allocation2 + $0x30] sm:$0xff]  ;;  %v3713_v62 = vld [vmem:[%s4604_s4 + $0xf0] sm:$0xff]  }
 0x178   : > { %1727 = vst [vmem:[#allocation2 + $0x81] sm:$0xff] %v4320_v54  ;;  %v4332_v2 = vsel %vm1679_vm12, %v1671_v43, %v1687_v47  ;;  %v4334_v4 = vld [vmem:[#allocation2 + $0x22] sm:$0xff]  ;;  %v1787_v7 = vpack.c.bf16 %v4320_v54, %v4309_v29  ;;  %v3714_v42 = vld [vmem:[%s4604_s4 + $0xb0] sm:$0xff]  }
 0x179   : > { %1725 = vst [vmem:[#allocation2 + $0x61] sm:$0xff] %v4332_v2  ;;  %2555 = vmatmul.mubr.bf16.vlgmr.msra.gmra.mrb[8].mxu1 %v1736_v59  ;;  %v4343_v12 = vpack.c.bf16 %v4336_v6, %v4334_v4  ;;  %v4347_v14 = vpack.c.bf16 %v4309_v29, %v4332_v2  ;;  %v1786_v18 = vpack.c.bf16 %v4332_v2, %v4312_v46  ;;  %v1730_v50 = vld [vmem:[#allocation2 + $0x20] sm:$0xff]  ;;  %v3717_v43 = vld [vmem:[%s4604_s4 + $0x140] sm:$0xff]   ;;  %v1753_v47 = vld [vmem:[#allocation2 + $0x12] sm:$0xff] }
 0x17a   : > { %3254 = vmatpush3.bf16.msra.mxu1 %v3701_v52  ;;  %2562 = vmatprep.mubr.bf16.mxu1 %v4305_v28  ;;  %v4378_v24 = vpack.c.bf16 %v1731_v32, %v1730_v50  ;;  %v1732_v33 = vld [vmem:[#allocation2 + $0x40] sm:$0xff]  ;;  %v1772_v39 = vpack.c.bf16 %v1730_v50, %v4314_v49  ;;  %v3718_v49 = vld [vmem:[%s4604_s4 + $0x100] sm:$0xff]   ;;  %v3719_v59 = vld [vmem:[%s4604_s4 + $0x148] sm:$0xff]  }
 0x17b   : > { %3501 = vmatprep.mubr.bf16.mxu0 %v4343_v12  ;;  %3255 = vmatprep.subr.bf16.mxu1 %v3702_v60  ;;  %v3716_v41 = vld [vmem:[%s4604_s4 + $0xb8] sm:$0xff]   ;;  %v1773_v60 = vpack.c.bf16 %v1732_v33, %v1731_v32  ;;  %v3722_v50 = vld [vmem:[%s4604_s4 + $0x110] sm:$0xff]  }
 0x17c   : > { %v1752_v44 = vld [vmem:[#allocation2 + $0x2] sm:$0xff] }
 0x17d   : > { %v1735_v27 = vld [vmem:[#allocation2 + $0x70] sm:$0xff]  ;;  %v1760_v52 = vpack.c.bf16 %v1753_v47, %v1752_v44  ;;  %v3747_v46 = vld [vmem:[%s4604_s4 + $0x1f8] sm:$0xff]  }
 0x17e   : > { %3256 = vmatpush3.bf16.msra.mxu1 %v3704_v17  ;;  %v4372_v8 = vld [vmem:[#allocation2 + $0x52] sm:$0xff]  ;;  %v3748_v2 = vld [vmem:[%s4604_s4 + $0x1b8] sm:$0xff]  }
 0x17f   : > { %3257 = vmatprep.subr.bf16.mxu1 %v3705_v45  ;;  %v4376_v23 = vpack.c.bf16 %v4372_v8, %v4370_v21  ;;  %v1733_v37 = vld [vmem:[#allocation2 + $0x50] sm:$0xff]  ;;  %v3721_v45 = vld [vmem:[%s4604_s4 + $0x150] sm:$0xff]  }
 0x180   : > { %v4395_v63 = vpack.c.bf16 %v1733_v37, %v1732_v33  ;;  %v1734_v15 = vld [vmem:[#allocation2 + $0x60] sm:$0xff]  ;;  %v3720_v17 = vld [vmem:[%s4604_s4 + $0x108] sm:$0xff]  }
 0x181   : > { %3502 = vmatmul.mubr.bf16.vlgmr.msra.gmra.mrb[8].mxu0 %v4376_v23  ;;  %2563 = vmatmul.mubr.bf16.gmra.mrb[12].mxu1 %v4378_v24  ;;  %v4411_v31 = vpack.c.bf16 %v1735_v27, %v1734_v15  ;;  %v1774_v32 = vpack.c.bf16 %v1734_v15, %v1733_v37  ;;  %v3726_v37 = vld [vmem:[%s4604_s4 + $0x120] sm:$0xff]   ;;  %v3730_v15 = vld [vmem:[%s4604_s4 + $0x130] sm:$0xff]   ;;  %v3736_v44 = vld [vmem:[%s4604_s4 + $0x188] sm:$0xff]  }
 0x182   : > { %3258 = vmatpush3.bf16.msra.mxu1 %v3706_v19  ;;  %2570 = vmatprep.mubr.bf16.mxu1 %v4329_v61  ;;  %v3723_v19 = vld [vmem:[%s4604_s4 + $0x158] sm:$0xff]  }
 0x183   : > { %3259 = vmatprep.subr.bf16.mxu1 %v3707_v25  ;;  %v3724_v25 = vld [vmem:[%s4604_s4 + $0x118] sm:$0xff]  }
 0x186   : > { %3260 = vmatpush3.bf16.msra.mxu1 %v3708_v20  ;;  %v3725_v20 = vld [vmem:[%s4604_s4 + $0x160] sm:$0xff]  }
 0x187   : > { %3261 = vmatprep.subr.bf16.mxu1 %v3709_v58  ;;  %v4449_v58 = vld [vmem:[#allocation2 + $0x80] sm:$0xff] }
 0x188   : > { %v1775_v33 = vpack.c.bf16 %v4449_v58, %v1735_v27  ;;  %v3731_v27 = vld [vmem:[%s4604_s4 + $0x178] sm:$0xff]  }
 0x189   : > { %2571 = vmatmul.mubr.bf16.gmra.mrb[16].mxu1 %v4395_v63 }
 0x18a   : > { %3262 = vmatpush3.bf16.msra.mxu1 %v3710_v13  ;;  %2578 = vmatprep.mubr.bf16.mxu1 %v4347_v14  ;;  %v3728_v13 = vld [vmem:[%s4604_s4 + $0x128] sm:$0xff]  }
 0x18b   : > { %3263 = vmatprep.subr.bf16.mxu1 %v3711_v26  ;;  %v3729_v26 = vld [vmem:[%s4604_s4 + $0x170] sm:$0xff]  }
 0x18e   : > { %3264 = vmatpush3.bf16.msra.mxu1 %v3712_v22  ;;  %v1758_v22 = vld [vmem:[#allocation2 + $0x62] sm:$0xff] }
 0x18f   : > { %3265 = vmatprep.subr.bf16.mxu1 %v3713_v62  ;;  %v1759_v62 = vld [vmem:[#allocation2 + $0x72] sm:$0xff]  ;;  %v1798_v9 = vpack.c.bf16 %v1758_v22, %v4372_v8  ;;  %v3742_v8 = vld [vmem:[%s4604_s4 + $0x1a0] sm:$0xff]  }
 0x191   : > { %2579 = vmatmul.mubr.bf16.gmra.mrb[20].mxu1 %v4411_v31 }
 0x192   : > { %3266 = vmatpush3.bf16.msra.mxu1 %v3714_v42  ;;  %2619 = vmatprep.mubr.bf16.mxu1 %v1772_v39  ;;  %v1796_v42 = vpack.c.bf16 %v4334_v4, %v1753_v47  ;;  %v3733_v39 = vld [vmem:[%s4604_s4 + $0x1c0] sm:$0xff]   ;;  %v3735_v4 = vld [vmem:[%s4604_s4 + $0x1c8] sm:$0xff]   ;;  %v3737_v47 = vld [vmem:[%s4604_s4 + $0x1d0] sm:$0xff]  }
 0x193   : > { %3267 = vmatprep.subr.bf16.mxu1 %v3715_v38  ;;  %v3732_v38 = vld [vmem:[%s4604_s4 + $0x138] sm:$0xff]  }
 0x196   : > { %3268 = vmatpush3.bf16.msra.mxu1 %v3716_v41  ;;  %v3734_v41 = vld [vmem:[%s4604_s4 + $0x180] sm:$0xff]  }
 0x197   : > { %3293 = vmatprep.subr.bf16.mxu1 %v3717_v43  ;;  %v1797_v43 = vpack.c.bf16 %v4370_v21, %v4336_v6  ;;  %v3738_v6 = vld [vmem:[%s4604_s4 + $0x190] sm:$0xff]   ;;  %v3741_v21 = vld [vmem:[%s4604_s4 + $0x1e0] sm:$0xff]  }
 0x199   : > { %2620 = vmatmul.mubr.bf16.vlgmr.msra.gmra.mrb[24].mxu1 %v1760_v52  ;;  %v3745_v52 = vld [vmem:[%s4604_s4 + $0x1f0] sm:$0xff]  }
 0x19a   : > { %3294 = vmatpush3.bf16.msra.mxu1 %v3718_v49  ;;  %2627 = vmatprep.mubr.bf16.mxu1 %v1773_v60  ;;  %v1795_v49 = vld [vmem:[#allocation2 + $0x82] sm:$0xff] }
 0x19b   : > { %3295 = vmatprep.subr.bf16.mxu1 %v3719_v59  ;;  %v1799_v55 = vpack.c.bf16 %v1795_v49, %v1759_v62  ;;  %v3746_v59 = vld [vmem:[%s4604_s4 + $0x1b0] sm:$0xff]  }
 0x19e   : > { %3296 = vmatpush3.bf16.msra.mxu1 %v3720_v17 }
 0x19f   : > { %3297 = vmatprep.subr.bf16.mxu1 %v3721_v45 }
 0x1a1   : > { %2628 = vmatmul.mubr.bf16.gmra.mrb[28].mxu1 %v4343_v12  ;;  %v3727_v12 = vld [vmem:[%s4604_s4 + $0x168] sm:$0xff]  }
 0x1a2   : > { %3298 = vmatpush3.bf16.msra.mxu1 %v3722_v50  ;;  %2635 = vmatprep.mubr.bf16.mxu1 %v1774_v32 }
 0x1a3   : > { %3299 = vmatprep.subr.bf16.mxu1 %v3723_v19 }
 0x1a6   : > { %3300 = vmatpush3.bf16.msra.mxu1 %v3724_v25 }
 0x1a7   : > { %3301 = vmatprep.subr.bf16.mxu1 %v3725_v20 }
 0x1a9   : > { %2636 = vmatmul.mubr.bf16.gmra.mrb[32].mxu1 %v4376_v23  ;;  %v4468_v23 = vpack.c.bf16 %v1759_v62, %v1758_v22 }
 0x1aa   : > { %3302 = vmatpush3.bf16.msra.mxu1 %v3726_v37  ;;  %2643 = vmatprep.mubr.bf16.mxu1 %v1775_v33 }
 0x1ab   : > { %3303 = vmatprep.subr.bf16.mxu1 %v3727_v12 }
 0x1ae   : > { %3304 = vmatpush3.bf16.msra.mxu1 %v3728_v13 }
 0x1af   : > { %3305 = vmatprep.subr.bf16.mxu1 %v3729_v26 }
 0x1b1   : > { %2644 = vmatmul.mubr.bf16.gmra.mrb[36].mxu1 %v4468_v23 }
 0x1b2   : > { %3306 = vmatpush3.bf16.msra.mxu1 %v3730_v15  ;;  %2684 = vmatprep.mubr.bf16.mxu1 %v1796_v42 }
 0x1b3   : > { %3307 = vmatprep.subr.bf16.mxu1 %v3731_v27 }
 0x1b6   : > { %3308 = vmatpush3.bf16.msra.mxu1 %v3732_v38 }
 0x1b7   : > { %3333 = vmatprep.subr.bf16.mxu1 %v3733_v39 }
 0x1b9   : > { %2685 = vmatmul.mubr.bf16.vlgmr.msra.gmra.mrb[40].mxu1 %v1784_v30  ;;  %v3740_v30 = vld [vmem:[%s4604_s4 + $0x198] sm:$0xff]  }
 0x1ba   : > { %3334 = vmatpush3.bf16.msra.mxu1 %v3734_v41  ;;  %2692 = vmatprep.mubr.bf16.mxu1 %v1797_v43 }
 0x1bb   : > { %3335 = vmatprep.subr.bf16.mxu1 %v3735_v4 }
 0x1be   : > { %3336 = vmatpush3.bf16.msra.mxu1 %v3736_v44 }
 0x1bf   : > { %3337 = vmatprep.subr.bf16.mxu1 %v3737_v47 }
 0x1c1   : > { %2693 = vmatmul.mubr.bf16.gmra.mrb[44].mxu1 %v1785_v57  ;;  %v3744_v57 = vld [vmem:[%s4604_s4 + $0x1a8] sm:$0xff]  }
 0x1c2   : > { %3338 = vmatpush3.bf16.msra.mxu1 %v3738_v6  ;;  %2700 = vmatprep.mubr.bf16.mxu1 %v1798_v9 }
 0x1c3   : > { %3339 = vmatprep.subr.bf16.mxu1 %v3739_v36 }
 0x1c6   : > { %3340 = vmatpush3.bf16.msra.mxu1 %v3740_v30 }
 0x1c7   : > { %3341 = vmatprep.subr.bf16.mxu1 %v3741_v21 }
 0x1c9   : > { %2701 = vmatmul.mubr.bf16.gmra.mrb[48].mxu1 %v1786_v18 }
 0x1ca   : > { %3342 = vmatpush3.bf16.msra.mxu1 %v3742_v8  ;;  %2708 = vmatprep.mubr.bf16.mxu1 %v1799_v55 }
 0x1cb   : > { %3343 = vmatprep.subr.bf16.mxu1 %v3743_v11 }
 0x1ce   : > { %3344 = vmatpush3.bf16.msra.mxu1 %v3744_v57 }
 0x1cf   : > { %3345 = vmatprep.subr.bf16.mxu1 %v3745_v52 }
 0x1d1   : > { %2709 = vmatmul.mubr.bf16.gmra.mrb[52].mxu1 %v1787_v7 }
 0x1d2   : > { %3346 = vmatpush3.bf16.msra.mxu1 %v3746_v59  ;;  %2749 = vmatprep.mubr.bf16.mxu1 %v4305_v28  ;;  %v1820_v28 = vld [vmem:[#allocation2 + $0x91] sm:$0xff] }
 0x1d3   : > { %3347 = vmatprep.subr.bf16.mxu1 %v3747_v46 }
 0x1d6   : > { %3348 = vmatpush3.bf16.msra.mxu1 %v3748_v2 }
 0x1d7   : > { %3509 = vmatprep.subr.bf16.mxu1 %v4135_v34 }
 0x1d9   : > { %2750 = vmatmul.mubr.bf16.vlgmr.msra.gmra.mrb[56].mxu1 %v4378_v24 }
 0x1da   : > { %3517 = vmatpush3.bf16.msra.mxu1 %v4135_v34  ;;  %2757 = vmatprep.mubr.bf16.mxu1 %v4329_v61  ;;  %v1824_v34 = vpack.c.bf16 %v1820_v28, %v4320_v54 }
 0x1db   : > { %3510 = vmatprep.subr.bf16.mxu1 %v4174_v56 }
 0x1de   : > { %3518 = vmatpush3.bf16.msra.mxu1 %v4174_v56  ;;  %v1812_v56 = vpack.c.bf16 %v3757_v48, %v4449_v58 }
 0x1df   : > { %3511 = vmatprep.subr.bf16.mxu1 %v4195_v40 }
 0x1e1   : > { %2758 = vmatmul.mubr.bf16.gmra.mrb[60].mxu1 %v4395_v63 }
 0x1e2   : > { %3519 = vmatpush3.bf16.msra.mxu1 %v4195_v40  ;;  %2765 = vmatprep.mubr.bf16.mxu1 %v4347_v14  ;;  %v1832_v40 = vld [vmem:[#allocation2 + $0x92] sm:$0xff] }
 0x1e3   : > { %3512 = vmatprep.subr.bf16.mxu1 %v4228_v53 }
 0x1e6   : > { %3520 = vmatpush3.bf16.msra.mxu1 %v4228_v53  ;;  %v1836_v53 = vpack.c.bf16 %v1832_v40, %v1795_v49 }
 0x1e7   : > { %3513 = vmatprep.subr.bf16.mxu1 %v4244_v0 }
 0x1e9   : > { %2766 = vmatmul.mubr.bf16.gmra.mrb[64].mxu1 %v4411_v31 }
 0x1ea   : > { %3521 = vmatpush3.bf16.msra.mxu1 %v4244_v0  ;;  %2773 = vmatprep.mubr.bf16.mxu1 %v1824_v34 }
 0x1eb   : > { %3514 = vmatprep.subr.bf16.mxu1 %v4258_v5 }
 0x1ee   : > { %3522 = vmatpush3.bf16.msra.mxu1 %v4258_v5 }
 0x1ef   : > { %3515 = vmatprep.subr.bf16.mxu1 %v4271_v51 }
 0x1f1   : > { %2774 = vmatmul.mubr.bf16.gmra.mrb[68].mxu1 %v1812_v56 }
 0x1f2   : > { %3523 = vmatpush3.bf16.msra.mxu1 %v4271_v51  ;;  %3505 = vmatprep.mubr.bf16.mxu1 %v4468_v23 }
 0x1f3   : > { %3516 = vmatprep.subr.bf16.mxu1 %v4278_v10 }
 0x1f6   : > { %3524 = vmatpush3.bf16.msra.mxu1 %v4278_v10 }
 0x1f9   : > { %3506 = vmatmul.mubr.bf16.vlgmr.msra.gmra.mrb[4].mxu1 %v1836_v53 }
 0x24c   : > { %v3229_v0 = vpop.f32.mrb[8].mxu1 }
 0x24d   : > { %v3230_v29 = vpop.f32.mrb[9].mxu1 }
 0x24e   : > { %v3231_v5 = vadd.f32 %v3230_v29, %v3229_v0  ;;  %v3232_v54 = vpop.f32.mrb[10].mxu1 }
 0x24f   : > { %v3233_v61 = vpop.f32.mrb[11].mxu1 }
 0x250   : > { %v2557_v7 = vadd.f32 %v3231_v5, %v4357_v35  ;;  %v3234_v48 = vadd.f32 %v3233_v61, %v3232_v54 }
 0x252   : > { %v2560_v14 = vadd.f32 %v3234_v48, %v4365_v3 }
 0x254   : > { %v4569_v51 = vpop.f32.mrb[8].mxu0  ;;  %v3235_v18 = vpop.f32.mrb[12].mxu1 }
 0x255   : > { %v4571_v24 = vpop.f32.mrb[9].mxu0  ;;  %v3236_v63 = vpop.f32.mrb[13].mxu1 }
 0x256   : > { %v3237_v31 = vadd.f32 %v3236_v63, %v3235_v18  ;;  %v4573_v10 = vpop.f32.mrb[10].mxu0  ;;  %v3238_v60 = vpop.f32.mrb[14].mxu1 }
 0x257   : > { %v4575_v17 = vpop.f32.mrb[11].mxu0  ;;  %v3239_v45 = vpop.f32.mrb[15].mxu1 }
 0x258   : > { %v2565_v50 = vadd.f32 %v4349_v16, %v3237_v31  ;;  %v3240_v19 = vadd.f32 %v3239_v45, %v3238_v60 }
 0x25a   : > { %v2568_v35 = vadd.f32 %v4363_v1, %v3240_v19 }
 0x25c   : > { %v3241_v32 = vpop.f32.mrb[16].mxu1 }
 0x25d   : > { %v3242_v3 = vpop.f32.mrb[17].mxu1 }
 0x25e   : > { %v3243_v25 = vadd.f32 %v3242_v3, %v3241_v32  ;;  %v3244_v20 = vpop.f32.mrb[18].mxu1 }
 0x25f   : > { %v3245_v58 = vpop.f32.mrb[19].mxu1 }
 0x260   : > { %v3246_v37 = vadd.f32 %v3245_v58, %v3244_v20 }
 0x264   : > { %v3247_v12 = vpop.f32.mrb[20].mxu1 }
 0x265   : > { %v3248_v33 = vpop.f32.mrb[21].mxu1 }
 0x266   : > { %v3249_v13 = vadd.f32 %v3248_v33, %v3247_v12  ;;  %v3250_v26 = vpop.f32.mrb[22].mxu1 }
 0x267   : > { %v3251_v22 = vpop.f32.mrb[23].mxu1 }
 0x268   : > { %v3252_v62 = vadd.f32 %v3251_v22, %v3250_v26 }
 0x26c   : > { %v3269_v15 = vpop.f32.mrb[24].mxu1 }
 0x26d   : > { %v3270_v23 = vpop.f32.mrb[25].mxu1 }
 0x26e   : > { %v3271_v27 = vadd.f32 %v3270_v23, %v3269_v15  ;;  %v3272_v42 = vpop.f32.mrb[26].mxu1 }
 0x26f   : > { %v3273_v16 = vpop.f32.mrb[27].mxu1 }
 0x270   : > { %v2622_v38 = vadd.f32 %v3271_v27, %v2557_v7  ;;  %v3274_v39 = vadd.f32 %v3273_v16, %v3272_v42 }
 0x272   : > { %v2625_v1 = vadd.f32 %v3274_v39, %v2560_v14 }
 0x274   : > { %v3275_v41 = vpop.f32.mrb[28].mxu1 }
 0x275   : > { %v3276_v4 = vpop.f32.mrb[29].mxu1 }
 0x276   : > { %v3277_v43 = vadd.f32 %v3276_v4, %v3275_v41  ;;  %v3278_v44 = vpop.f32.mrb[30].mxu1 }
 0x277   : > { %v3279_v47 = vpop.f32.mrb[31].mxu1 }
 0x278   : > { %v2630_v6 = vadd.f32 %v3277_v43, %v2565_v50  ;;  %v3280_v36 = vadd.f32 %v3279_v47, %v3278_v44 }
 0x27a   : > { %v2633_v9 = vadd.f32 %v3280_v36, %v2568_v35 }
 0x27c   : > { %v3281_v30 = vpop.f32.mrb[32].mxu1 }
 0x27d   : > { %v3282_v21 = vpop.f32.mrb[33].mxu1 }
 0x27e   : > { %v3283_v49 = vadd.f32 %v3282_v21, %v3281_v30  ;;  %v3284_v8 = vpop.f32.mrb[34].mxu1 }
 0x27f   : > { %v3285_v11 = vpop.f32.mrb[35].mxu1 }
 0x280   : > { %v3549_v55 = vadd.f32 %v3283_v49, %v3243_v25  ;;  %v3286_v57 = vadd.f32 %v3285_v11, %v3284_v8 }
 0x282   : > { %v3557_v52 = vadd.f32 %v3286_v57, %v3246_v37 }
 0x284   : > { %v3287_v59 = vpop.f32.mrb[36].mxu1 }
 0x285   : > { %v3288_v46 = vpop.f32.mrb[37].mxu1 }
 0x286   : > { %v3289_v2 = vadd.f32 %v3288_v46, %v3287_v59  ;;  %v3290_v28 = vpop.f32.mrb[38].mxu1 }
 0x287   : > { %v3291_v34 = vpop.f32.mrb[39].mxu1 }
 0x288   : > { %v3545_v56 = vadd.f32 %v3289_v2, %v3249_v13  ;;  %v3292_v40 = vadd.f32 %v3291_v34, %v3290_v28 }
 0x28a   : > { %v3553_v53 = vadd.f32 %v3292_v40, %v3252_v62 }
 0x28c   : > { %v3309_v0 = vpop.f32.mrb[40].mxu1 }
 0x28d   : > { %v3310_v29 = vpop.f32.mrb[41].mxu1 }
 0x28e   : > { %v3311_v5 = vadd.f32 %v3310_v29, %v3309_v0  ;;  %v3312_v54 = vpop.f32.mrb[42].mxu1 }
 0x28f   : > { %v3313_v61 = vpop.f32.mrb[43].mxu1 }
 0x290   : > { %v2687_v7 = vadd.f32 %v3311_v5, %v2622_v38  ;;  %v3314_v48 = vadd.f32 %v3313_v61, %v3312_v54 }
 0x292   : > { %v2690_v14 = vadd.f32 %v3314_v48, %v2625_v1 }
 0x294   : > { %v3315_v18 = vpop.f32.mrb[44].mxu1 }
 0x295   : > { %v3316_v63 = vpop.f32.mrb[45].mxu1 }
 0x296   : > { %v3317_v31 = vadd.f32 %v3316_v63, %v3315_v18  ;;  %v3318_v60 = vpop.f32.mrb[46].mxu1 }
 0x297   : > { %v3319_v45 = vpop.f32.mrb[47].mxu1 }
 0x298   : > { %v2695_v50 = vadd.f32 %v3317_v31, %v2630_v6  ;;  %v3320_v19 = vadd.f32 %v3319_v45, %v3318_v60 }
 0x29a   : > { %v2698_v35 = vadd.f32 %v3320_v19, %v2633_v9 }
 0x29c   : > { %v3321_v32 = vpop.f32.mrb[48].mxu1 }
 0x29d   : > { %v3322_v3 = vpop.f32.mrb[49].mxu1 }
 0x29e   : > { %v3323_v25 = vadd.f32 %v3322_v3, %v3321_v32  ;;  %v3324_v20 = vpop.f32.mrb[50].mxu1 }
 0x29f   : > { %v3325_v58 = vpop.f32.mrb[51].mxu1 }
 0x2a0   : > { %v3550_v37 = vadd.f32 %v3549_v55, %v3323_v25  ;;  %v3326_v12 = vadd.f32 %v3325_v58, %v3324_v20 }
 0x2a2   : > { %v3558_v33 = vadd.f32 %v3557_v52, %v3326_v12 }
 0x2a4   : > { %v3327_v13 = vpop.f32.mrb[52].mxu1 }
 0x2a5   : > { %v3328_v26 = vpop.f32.mrb[53].mxu1 }
 0x2a6   : > { %v3329_v22 = vadd.f32 %v3328_v26, %v3327_v13  ;;  %v3330_v62 = vpop.f32.mrb[54].mxu1 }
 0x2a7   : > { %v3331_v15 = vpop.f32.mrb[55].mxu1 }
 0x2a8   : > { %v3546_v23 = vadd.f32 %v3545_v56, %v3329_v22  ;;  %v3332_v27 = vadd.f32 %v3331_v15, %v3330_v62 }
 0x2aa   : > { %v3554_v42 = vadd.f32 %v3553_v53, %v3332_v27 }
 0x2ac   : > { %v3349_v16 = vpop.f32.mrb[56].mxu1 }
 0x2ad   : > { %v3350_v38 = vpop.f32.mrb[57].mxu1 }
 0x2ae   : > { %v3351_v39 = vadd.f32 %v3350_v38, %v3349_v16  ;;  %v3352_v1 = vpop.f32.mrb[58].mxu1 }
 0x2af   : > { %v3353_v41 = vpop.f32.mrb[59].mxu1 }
 0x2b0   : > { %v2752_v4 = vadd.f32 %v3351_v39, %v2687_v7  ;;  %v3354_v43 = vadd.f32 %v3353_v41, %v3352_v1 }
 0x2b2   : > { %v2817_v44 = vadd.f32 %v4571_v24, %v2752_v4  ;;  %v2755_v47 = vadd.f32 %v3354_v43, %v2690_v14 }
 0x2b4   : > { %2847 = vst [vmem:[%s4583_s23] sm:$0xff] %v2817_v44  ;;  %v2820_v6 = vadd.f32 %v4575_v17, %v2755_v47  ;;  %v3355_v36 = vpop.f32.mrb[60].mxu1 }
 0x2b5   : > { %v3356_v9 = vpop.f32.mrb[61].mxu1 }
 0x2b6   : > { %2848 = vst [vmem:[%s4583_s23 + $0x8] sm:$0xff] %v2820_v6  ;;  %v3357_v30 = vadd.f32 %v3356_v9, %v3355_v36  ;;  %v3358_v21 = vpop.f32.mrb[62].mxu1 }
 0x2b7   : > { %v3359_v49 = vpop.f32.mrb[63].mxu1 }
 0x2b8   : > { %v2760_v8 = vadd.f32 %v3357_v30, %v2695_v50  ;;  %v3360_v11 = vadd.f32 %v3359_v49, %v3358_v21 }
 0x2ba   : > { %v2825_v55 = vadd.f32 %v4569_v51, %v2760_v8  ;;  %v2763_v57 = vadd.f32 %v3360_v11, %v2698_v35 }
 0x2bc   : > { %2849 = vst [vmem:[%s4583_s23 + $0x10] sm:$0xff] %v2825_v55  ;;  %v2828_v52 = vadd.f32 %v4573_v10, %v2763_v57  ;;  %v3361_v24 = vpop.f32.mrb[64].mxu1 }
 0x2bd   : > { %v3362_v59 = vpop.f32.mrb[65].mxu1 }
 0x2be   : > { %2850 = vst [vmem:[%s4583_s23 + $0x18] sm:$0xff] %v2828_v52  ;;  %v3363_v46 = vadd.f32 %v3362_v59, %v3361_v24  ;;  %v3364_v2 = vpop.f32.mrb[66].mxu1 }
 0x2bf   : > { %v3365_v17 = vpop.f32.mrb[67].mxu1 }
 0x2c0   : > { %v3366_v28 = vadd.f32 %v3365_v17, %v3364_v2  ;;  %v3551_v34 = vadd.f32 %v3550_v37, %v3363_v46 }
 0x2c2   : > { %v3559_v56 = vadd.f32 %v3558_v33, %v3366_v28 }
 0x2c4   : > { %v3367_v40 = vpop.f32.mrb[68].mxu1 }
 0x2c5   : > { %v3368_v53 = vpop.f32.mrb[69].mxu1 }
 0x2c6   : > { %v3369_v0 = vadd.f32 %v3368_v53, %v3367_v40  ;;  %v3370_v51 = vpop.f32.mrb[70].mxu1 }
 0x2c7   : > { %v3371_v29 = vpop.f32.mrb[71].mxu1 }
 0x2c8   : > { %v3372_v5 = vadd.f32 %v3371_v29, %v3370_v51  ;;  %v3547_v10 = vadd.f32 %v3546_v23, %v3369_v0 }
 0x2ca   : > { %v3555_v54 = vadd.f32 %v3554_v42, %v3372_v5 }
 0x2cc   : > { %v3507_v61 = vpop.f32.mrb[4].mxu1 }
 0x2cd   : > { %v3548_v7 = vadd.f32 %v3547_v10, %v3507_v61  ;;  %v2832_v48 = vpop.f32.mrb[5].mxu1 }
 0x2ce   : > { %v3552_v14 = vadd.f32 %v3551_v34, %v2832_v48  ;;  %v3508_v18 = vpop.f32.mrb[6].mxu1 }
 0x2cf   : > { %2853 = vst [vmem:[%s4583_s23 + $0x30] sm:$0xff] %v3548_v7  ;;  %v3556_v63 = vadd.f32 %v3555_v54, %v3508_v18  ;;  %v2835_v31 = vpop.f32.mrb[7].mxu1 }
 0x2d0   : > { %2851 = vst [vmem:[%s4583_s23 + $0x20] sm:$0xff] %v3552_v14  ;;  %v3560_v60 = vadd.f32 %v3559_v56, %v2835_v31 }
 0x2d1   : > { %2854 = vst [vmem:[%s4583_s23 + $0x38] sm:$0xff] %v3556_v63 }
 0x2d2   : > { %2852 = vst [vmem:[%s4583_s23 + $0x28] sm:$0xff] %v3560_v60 }
 0x2d3 PF: > { %s16_s21 = sadd.s32 1, %s3755_s21  }
 0x2d4   : > { %p13_p4 = scmp.ge.s32.totalorder %s16_s21, 4  }
 0x2d6   :  { %15 = sbr.rel (!%p13_p4) target bundleno = 1 (0x1), region = 90 }

</bundles_post_ra>
